<compile_context>
chip_gen: v5e
topology: v5e:2x2
jax: 0.10.0
libtpu: 0.0.40
codegen_flags: <defaults>
</compile_context>

<pallas_src>
import functools

import jax
import jax.numpy as jnp
from jax import lax
from jax.experimental import pallas as pl
from jax.experimental.pallas import tpu as pltpu

EPS = 1e-15


def _prod_rows(t):
    """Product over axis 0 of a (R, C) value -> (1, C).

    R is a static power of two >= 8 (a W source row-block size): halving-tree
    VPU multiplies down to one sublane tile (8 rows), then a pltpu.roll based
    all-rows product (XLU sublane rotates; no sub-vreg 4/2/1 slicing)."""
    r = t.shape[0]
    while r > 8:
        half = r // 2
        t = t[:half, :] * t[half:, :]
        r = half
    for sh in (4, 2, 1):
        t = t * pltpu.roll(t, shift=sh, axis=0)
    return t[0:1, :]


def ic_kernel(w_ref, x0_ref, s_out_ref, x_out_ref, r_out_ref, *, steps, blk):
    n = w_ref.shape[0]
    nblk = n // blk
    nchunk = n // 128

    # 128x128 identity (64 KiB), hoisted out of the step loop: flips the (1, N)
    # q row into an (N, 1) column with N/128 tiny matmuls on the otherwise-idle
    # MXU.  Replaces v2's per-step O(N^2) diagonal-mask select + lane reduce.
    eye128 = (lax.broadcasted_iota(jnp.int32, (128, 128), 0)
              == lax.broadcasted_iota(jnp.int32, (128, 128), 1)
              ).astype(jnp.float32)

    def row_to_col(row):                       # (1, n) -> (n, 1), O(n) work
        cols = []
        for c in range(nchunk):
            chunk = row[:, c * 128:(c + 1) * 128]            # (1, 128) lane slice
            cols.append(lax.dot_general(
                eye128, chunk, (((1,), (1,)), ((), ())),
                preferred_element_type=jnp.float32))         # (128, 1)
        return cols[0] if nchunk == 1 else jnp.concatenate(cols, axis=0)

    x = x0_ref[...]                            # (n, 1) column, PyTorch layout
    s = 1.0 - x                                # init_state: s = 1 - x
    r = jnp.zeros_like(x)                      # init_state: r = 0

    def step(carry):
        s, x, r = carry
        # Fused running product over source row-blocks of W: no (N, N)
        # temporary, eps folded into the constant, x broadcast along lanes.
        #   acc[i, dst] = prod_b ((1+eps) - W[b*blk + i, dst] * x[b*blk + i])
        acc = (1.0 + EPS) - w_ref[0:blk, :] * x[0:blk, :]
        for b in range(1, nblk):
            lo = b * blk
            acc = acc * ((1.0 + EPS) - w_ref[lo:lo + blk, :] * x[lo:lo + blk, :])
        q_row = _prod_rows(acc)                # (1, n): q[dst] = prod_src (...)
        q = row_to_col(q_row)                  # (n, 1)
        return s * q, s * (1.0 - q), r + x

    if steps <= 8 and n <= 256:
        # Tiny problems: full unroll for scheduler visibility.
        for _ in range(steps):
            s, x, r = step((s, x, r))
    else:
        # Each step is thousands of bundles of (N, N) VPU work, so unrolling
        # only inflates vreg/VMEM pressure; fori_loop bounds live ranges.
        s, x, r = lax.fori_loop(0, steps, lambda i, c: step(c), (s, x, r))

    s_out_ref[...] = s
    x_out_ref[...] = x
    r_out_ref[...] = r


def _vmem_budget_bytes():
    """Usable scoped-VMEM budget for this generation, leaving headroom for
    Pallas-internal scratch: ~112 MiB on v5e/v6e (128 MiB parts), ~56 MiB on
    v7x (64 MiB parts); conservative 56 MiB if the query is unavailable."""
    cap = 64 * 1024 * 1024
    try:
        cap = int(pltpu.get_tpu_info().vmem_capacity_bytes)
    except Exception:
        pass
    headroom = max(8 << 20, cap // 8)
    return max(24 << 20, cap - headroom)


def ic_forward_pallas(W, x0, steps):
    """IC forward pass. W: (N, N) dense adjacency W[src, dst]; x0: (N, 1) seeds.

    Returns (s, x, r) as (N, 1) f32 columns, matching the PyTorch module."""
    N = W.shape[0]
    n_pad = max(128, ((N + 127) // 128) * 128)
    blk = 256 if n_pad % 256 == 0 else 128     # source row-block size

    w_bytes = 4 * n_pad * n_pad
    slab_bytes = 4 * blk * n_pad               # one (blk, n_pad) temporary
    need = w_bytes + 4 * slab_bytes + (4 << 20)
    budget = _vmem_budget_bytes()
    if need > budget:
        # TODO(synk): streamed variant for graphs that do not fit resident:
        # grid=(steps, n_pad // TILE_DST) with a W BlockSpec streaming dst tiles
        # from HBM, s/x/r in persistent VMEM scratch, src axis split across the
        # two v7x TensorCores (per-core partial q products just multiply), and a
        # sparse edge-list kernel (scalar-prefetched indices) when E << N^2.
        raise NotImplementedError(
            f"IC kernel needs ~{need >> 20} MiB resident VMEM (N_pad={n_pad}) but "
            f"only ~{budget >> 20} MiB is available on this TPU generation.")

    Wp = jnp.zeros((n_pad, n_pad), jnp.float32).at[:N, :N].set(W.astype(jnp.float32))
    x0_col = jnp.zeros((n_pad, 1), jnp.float32).at[:N, :].set(
        jnp.reshape(x0, (N, 1)).astype(jnp.float32))

    col = jax.ShapeDtypeStruct((n_pad, 1), jnp.float32)
    vmem = pl.BlockSpec(memory_space=pltpu.MemorySpace.VMEM)

    cost = pl.CostEstimate(
        flops=int(steps) * 3 * n_pad * n_pad,
        transcendentals=0,
        bytes_accessed=w_bytes + 6 * 4 * n_pad)

    s_col, x_col, r_col = pl.pallas_call(
        functools.partial(ic_kernel, steps=int(steps), blk=blk),
        out_shape=(col, col, col),
        in_specs=[vmem, vmem],
        out_specs=(vmem, vmem, vmem),
        cost_estimate=cost,
        compiler_params=pltpu.CompilerParams(
            vmem_limit_bytes=int(min(budget, max(need, 32 << 20)))),
    )(Wp, x0_col)

    return s_col[:N, :], x_col[:N, :], r_col[:N, :]


def init_x0(node_w, C):
    # TODO(synk): the x0=None branch of init_state uses an externally-set
    # self.w; we emulate it with a given node score and do the argsort / top-C
    # seed selection in plain-JAX glue (init path, not the hot loop).
    N = node_w.shape[0]
    ind = jnp.argsort(-node_w)
    return jnp.zeros((N, 1), jnp.float32).at[ind[:C]].set(1.0)


def ic_ref(erow, ecol, ew, x0, steps):
    """Pure-JAX reference mirroring the PyTorch sparse scatter_add semantics."""
    x = x0
    s = 1.0 - x
    r = jnp.zeros_like(x)
    for _ in range(steps):
        msgs = jnp.log(1.0 - ew[:, None] * x[erow] + EPS)    # (E, 1)
        agg = jnp.zeros_like(x).at[ecol].add(msgs)           # scatter_add over dst
        q = jnp.exp(agg)
        s, x, r = s * q, s * (1.0 - q), r + x
    return s, x, r


if __name__ == "__main__":
    def run_case(N, C, steps, E):
        key = jax.random.PRNGKey(0)
        k_edges, k_w, k_node = jax.random.split(key, 3)

        # Deterministic random graph with E unique directed edges and strictly
        # positive weights (so W != 0 is an exact edge mask when densifying).
        flat = jax.random.choice(k_edges, N * N, (E,), replace=False)
        erow = (flat // N).astype(jnp.int32)
        ecol = (flat % N).astype(jnp.int32)
        ew = jax.random.uniform(k_w, (E,), jnp.float32, 0.1, 0.9)
        W = jnp.zeros((N, N), jnp.float32).at[erow, ecol].set(ew)

        node_w = jax.random.uniform(k_node, (N,), jnp.float32)
        x0 = init_x0(node_w, C)

        s, x, r = jax.block_until_ready(ic_forward_pallas(W, x0, steps))

        sr, xr, rr = ic_ref(erow, ecol, ew, x0, steps)
        for got, want in ((s, sr), (x, xr), (r, rr)):
            assert got.shape == (N, 1) and got.dtype == jnp.float32
            # Product form vs exp(sum log) reference: pure f32 rounding (~1e-6);
            # 5e-5 still catches any real bug.
            assert float(jnp.max(jnp.abs(got - want))) < 5e-5

    # Small case: unrolled steps path, single source block, single 128-chunk flip.
    run_case(N=128, C=50, steps=4, E=512)
    # Larger case: fori_loop steps path, padded N (300 -> 384), multiple source
    # row-blocks and multiple 128-chunks in the row->column flip.
    run_case(N=300, C=30, steps=10, E=2000)

    print("KERNEL_OK")
</pallas_src>

<mosaic_0001>
module attributes {stable_mosaic.version = 11 : i64} {
  func.func @ic_kernel(%arg0: memref<128x128xf32, #tpu.memory_space<vmem>>, %arg1: memref<128x1xf32, #tpu.memory_space<vmem>>, %arg2: memref<128x1xf32, #tpu.memory_space<vmem>>, %arg3: memref<128x1xf32, #tpu.memory_space<vmem>>, %arg4: memref<128x1xf32, #tpu.memory_space<vmem>>) attributes {dimension_semantics = [], scalar_prefetch = 0 : i64, scratch_operands = 0 : i64, tpu.core_type = #tpu.core_type<tc>} {
    %0 = tpu.iota {dimensions = array<i32: 0>} : vector<128x128xi32>
    %1 = tpu.iota {dimensions = array<i32: 1>} : vector<128x128xi32>
    %2 = arith.cmpi eq, %0, %1 : vector<128x128xi32>
    %3 = arith.extui %2 : vector<128x128xi1> to vector<128x128xi32>
    %4 = arith.sitofp %3 : vector<128x128xi32> to vector<128x128xf32>
    %c0 = arith.constant 0 : index
    %c0_0 = arith.constant 0 : index
    %5 = vector.load %arg1[%c0, %c0_0] : memref<128x1xf32, #tpu.memory_space<vmem>>, vector<128x1xf32>
    %cst = arith.constant 1.000000e+00 : f32
    %6 = vector.broadcast %cst : f32 to vector<128x1xf32>
    %7 = arith.subf %6, %5 : vector<128x1xf32>
    %cst_1 = arith.constant 0.000000e+00 : f32
    %8 = vector.broadcast %cst_1 : f32 to vector<128x1xf32>
    %c0_2 = arith.constant 0 : index
    %c0_3 = arith.constant 0 : index
    %9 = vector.load %arg0[%c0_2, %c0_3] : memref<128x128xf32, #tpu.memory_space<vmem>>, vector<128x128xf32>
    %10 = vector.broadcast %5 : vector<128x1xf32> to vector<128x128xf32>
    %11 = arith.mulf %9, %10 : vector<128x128xf32>
    %cst_4 = arith.constant 1.000000e+00 : f32
    %12 = vector.broadcast %cst_4 : f32 to vector<128x128xf32>
    %13 = arith.subf %12, %11 : vector<128x128xf32>
    %14 = vector.extract_strided_slice %13 {offsets = [0, 0], sizes = [64, 128], strides = [1, 1]} : vector<128x128xf32> to vector<64x128xf32>
    %15 = vector.extract_strided_slice %13 {offsets = [64, 0], sizes = [64, 128], strides = [1, 1]} : vector<128x128xf32> to vector<64x128xf32>
    %16 = arith.mulf %14, %15 : vector<64x128xf32>
    %17 = vector.extract_strided_slice %16 {offsets = [0, 0], sizes = [32, 128], strides = [1, 1]} : vector<64x128xf32> to vector<32x128xf32>
    %18 = vector.extract_strided_slice %16 {offsets = [32, 0], sizes = [32, 128], strides = [1, 1]} : vector<64x128xf32> to vector<32x128xf32>
    %19 = arith.mulf %17, %18 : vector<32x128xf32>
    %20 = vector.extract_strided_slice %19 {offsets = [0, 0], sizes = [16, 128], strides = [1, 1]} : vector<32x128xf32> to vector<16x128xf32>
    %21 = vector.extract_strided_slice %19 {offsets = [16, 0], sizes = [16, 128], strides = [1, 1]} : vector<32x128xf32> to vector<16x128xf32>
    %22 = arith.mulf %20, %21 : vector<16x128xf32>
    %23 = vector.extract_strided_slice %22 {offsets = [0, 0], sizes = [8, 128], strides = [1, 1]} : vector<16x128xf32> to vector<8x128xf32>
    %24 = vector.extract_strided_slice %22 {offsets = [8, 0], sizes = [8, 128], strides = [1, 1]} : vector<16x128xf32> to vector<8x128xf32>
    %25 = arith.mulf %23, %24 : vector<8x128xf32>
    %c4_i32 = arith.constant 4 : i32
    %26 = tpu.dynamic_rotate %25 by %c4_i32 dim 0 : vector<8x128xf32>, i32 -> vector<8x128xf32>
    %27 = arith.mulf %25, %26 : vector<8x128xf32>
    %c2_i32 = arith.constant 2 : i32
    %28 = tpu.dynamic_rotate %27 by %c2_i32 dim 0 : vector<8x128xf32>, i32 -> vector<8x128xf32>
    %29 = arith.mulf %27, %28 : vector<8x128xf32>
    %c1_i32 = arith.constant 1 : i32
    %30 = tpu.dynamic_rotate %29 by %c1_i32 dim 0 : vector<8x128xf32>, i32 -> vector<8x128xf32>
    %31 = arith.mulf %29, %30 : vector<8x128xf32>
    %32 = vector.extract_strided_slice %31 {offsets = [0, 0], sizes = [1, 128], strides = [1, 1]} : vector<8x128xf32> to vector<1x128xf32>
    %cst_5 = arith.constant dense<0.000000e+00> : vector<128x1xf32>
    %33 = tpu.matmul %4, %32, %cst_5 {dimension_numbers = #tpu.dot_dimension_numbers<[1], [1], [0], [0], [0, 0, 1, 0], [], []>} : vector<128x128xf32>, vector<1x128xf32>, vector<128x1xf32> -> vector<128x1xf32>
    %34 = arith.mulf %7, %33 : vector<128x1xf32>
    %cst_6 = arith.constant 1.000000e+00 : f32
    %35 = vector.broadcast %cst_6 : f32 to vector<128x1xf32>
    %36 = arith.subf %35, %33 : vector<128x1xf32>
    %37 = arith.mulf %7, %36 : vector<128x1xf32>
    %38 = arith.addf %8, %5 : vector<128x1xf32>
    %c0_7 = arith.constant 0 : index
    %c0_8 = arith.constant 0 : index
    %39 = vector.load %arg0[%c0_7, %c0_8] : memref<128x128xf32, #tpu.memory_space<vmem>>, vector<128x128xf32>
    %40 = vector.broadcast %37 : vector<128x1xf32> to vector<128x128xf32>
    %41 = arith.mulf %39, %40 : vector<128x128xf32>
    %cst_9 = arith.constant 1.000000e+00 : f32
    %42 = vector.broadcast %cst_9 : f32 to vector<128x128xf32>
    %43 = arith.subf %42, %41 : vector<128x128xf32>
    %44 = vector.extract_strided_slice %43 {offsets = [0, 0], sizes = [64, 128], strides = [1, 1]} : vector<128x128xf32> to vector<64x128xf32>
    %45 = vector.extract_strided_slice %43 {offsets = [64, 0], sizes = [64, 128], strides = [1, 1]} : vector<128x128xf32> to vector<64x128xf32>
    %46 = arith.mulf %44, %45 : vector<64x128xf32>
    %47 = vector.extract_strided_slice %46 {offsets = [0, 0], sizes = [32, 128], strides = [1, 1]} : vector<64x128xf32> to vector<32x128xf32>
    %48 = vector.extract_strided_slice %46 {offsets = [32, 0], sizes = [32, 128], strides = [1, 1]} : vector<64x128xf32> to vector<32x128xf32>
    %49 = arith.mulf %47, %48 : vector<32x128xf32>
    %50 = vector.extract_strided_slice %49 {offsets = [0, 0], sizes = [16, 128], strides = [1, 1]} : vector<32x128xf32> to vector<16x128xf32>
    %51 = vector.extract_strided_slice %49 {offsets = [16, 0], sizes = [16, 128], strides = [1, 1]} : vector<32x128xf32> to vector<16x128xf32>
    %52 = arith.mulf %50, %51 : vector<16x128xf32>
    %53 = vector.extract_strided_slice %52 {offsets = [0, 0], sizes = [8, 128], strides = [1, 1]} : vector<16x128xf32> to vector<8x128xf32>
    %54 = vector.extract_strided_slice %52 {offsets = [8, 0], sizes = [8, 128], strides = [1, 1]} : vector<16x128xf32> to vector<8x128xf32>
    %55 = arith.mulf %53, %54 : vector<8x128xf32>
    %c4_i32_10 = arith.constant 4 : i32
    %56 = tpu.dynamic_rotate %55 by %c4_i32_10 dim 0 : vector<8x128xf32>, i32 -> vector<8x128xf32>
    %57 = arith.mulf %55, %56 : vector<8x128xf32>
    %c2_i32_11 = arith.constant 2 : i32
    %58 = tpu.dynamic_rotate %57 by %c2_i32_11 dim 0 : vector<8x128xf32>, i32 -> vector<8x128xf32>
    %59 = arith.mulf %57, %58 : vector<8x128xf32>
    %c1_i32_12 = arith.constant 1 : i32
    %60 = tpu.dynamic_rotate %59 by %c1_i32_12 dim 0 : vector<8x128xf32>, i32 -> vector<8x128xf32>
    %61 = arith.mulf %59, %60 : vector<8x128xf32>
    %62 = vector.extract_strided_slice %61 {offsets = [0, 0], sizes = [1, 128], strides = [1, 1]} : vector<8x128xf32> to vector<1x128xf32>
    %cst_13 = arith.constant dense<0.000000e+00> : vector<128x1xf32>
    %63 = tpu.matmul %4, %62, %cst_13 {dimension_numbers = #tpu.dot_dimension_numbers<[1], [1], [0], [0], [0, 0, 1, 0], [], []>} : vector<128x128xf32>, vector<1x128xf32>, vector<128x1xf32> -> vector<128x1xf32>
    %64 = arith.mulf %34, %63 : vector<128x1xf32>
    %cst_14 = arith.constant 1.000000e+00 : f32
    %65 = vector.broadcast %cst_14 : f32 to vector<128x1xf32>
    %66 = arith.subf %65, %63 : vector<128x1xf32>
    %67 = arith.mulf %34, %66 : vector<128x1xf32>
    %68 = arith.addf %38, %37 : vector<128x1xf32>
    %c0_15 = arith.constant 0 : index
    %c0_16 = arith.constant 0 : index
    %69 = vector.load %arg0[%c0_15, %c0_16] : memref<128x128xf32, #tpu.memory_space<vmem>>, vector<128x128xf32>
    %70 = vector.broadcast %67 : vector<128x1xf32> to vector<128x128xf32>
    %71 = arith.mulf %69, %70 : vector<128x128xf32>
    %cst_17 = arith.constant 1.000000e+00 : f32
    %72 = vector.broadcast %cst_17 : f32 to vector<128x128xf32>
    %73 = arith.subf %72, %71 : vector<128x128xf32>
    %74 = vector.extract_strided_slice %73 {offsets = [0, 0], sizes = [64, 128], strides = [1, 1]} : vector<128x128xf32> to vector<64x128xf32>
    %75 = vector.extract_strided_slice %73 {offsets = [64, 0], sizes = [64, 128], strides = [1, 1]} : vector<128x128xf32> to vector<64x128xf32>
    %76 = arith.mulf %74, %75 : vector<64x128xf32>
    %77 = vector.extract_strided_slice %76 {offsets = [0, 0], sizes = [32, 128], strides = [1, 1]} : vector<64x128xf32> to vector<32x128xf32>
    %78 = vector.extract_strided_slice %76 {offsets = [32, 0], sizes = [32, 128], strides = [1, 1]} : vector<64x128xf32> to vector<32x128xf32>
    %79 = arith.mulf %77, %78 : vector<32x128xf32>
    %80 = vector.extract_strided_slice %79 {offsets = [0, 0], sizes = [16, 128], strides = [1, 1]} : vector<32x128xf32> to vector<16x128xf32>
    %81 = vector.extract_strided_slice %79 {offsets = [16, 0], sizes = [16, 128], strides = [1, 1]} : vector<32x128xf32> to vector<16x128xf32>
    %82 = arith.mulf %80, %81 : vector<16x128xf32>
    %83 = vector.extract_strided_slice %82 {offsets = [0, 0], sizes = [8, 128], strides = [1, 1]} : vector<16x128xf32> to vector<8x128xf32>
    %84 = vector.extract_strided_slice %82 {offsets = [8, 0], sizes = [8, 128], strides = [1, 1]} : vector<16x128xf32> to vector<8x128xf32>
    %85 = arith.mulf %83, %84 : vector<8x128xf32>
    %c4_i32_18 = arith.constant 4 : i32
    %86 = tpu.dynamic_rotate %85 by %c4_i32_18 dim 0 : vector<8x128xf32>, i32 -> vector<8x128xf32>
    %87 = arith.mulf %85, %86 : vector<8x128xf32>
    %c2_i32_19 = arith.constant 2 : i32
    %88 = tpu.dynamic_rotate %87 by %c2_i32_19 dim 0 : vector<8x128xf32>, i32 -> vector<8x128xf32>
    %89 = arith.mulf %87, %88 : vector<8x128xf32>
    %c1_i32_20 = arith.constant 1 : i32
    %90 = tpu.dynamic_rotate %89 by %c1_i32_20 dim 0 : vector<8x128xf32>, i32 -> vector<8x128xf32>
    %91 = arith.mulf %89, %90 : vector<8x128xf32>
    %92 = vector.extract_strided_slice %91 {offsets = [0, 0], sizes = [1, 128], strides = [1, 1]} : vector<8x128xf32> to vector<1x128xf32>
    %cst_21 = arith.constant dense<0.000000e+00> : vector<128x1xf32>
    %93 = tpu.matmul %4, %92, %cst_21 {dimension_numbers = #tpu.dot_dimension_numbers<[1], [1], [0], [0], [0, 0, 1, 0], [], []>} : vector<128x128xf32>, vector<1x128xf32>, vector<128x1xf32> -> vector<128x1xf32>
    %94 = arith.mulf %64, %93 : vector<128x1xf32>
    %cst_22 = arith.constant 1.000000e+00 : f32
    %95 = vector.broadcast %cst_22 : f32 to vector<128x1xf32>
    %96 = arith.subf %95, %93 : vector<128x1xf32>
    %97 = arith.mulf %64, %96 : vector<128x1xf32>
    %98 = arith.addf %68, %67 : vector<128x1xf32>
    %c0_23 = arith.constant 0 : index
    %c0_24 = arith.constant 0 : index
    %99 = vector.load %arg0[%c0_23, %c0_24] : memref<128x128xf32, #tpu.memory_space<vmem>>, vector<128x128xf32>
    %100 = vector.broadcast %97 : vector<128x1xf32> to vector<128x128xf32>
    %101 = arith.mulf %99, %100 : vector<128x128xf32>
    %cst_25 = arith.constant 1.000000e+00 : f32
    %102 = vector.broadcast %cst_25 : f32 to vector<128x128xf32>
    %103 = arith.subf %102, %101 : vector<128x128xf32>
    %104 = vector.extract_strided_slice %103 {offsets = [0, 0], sizes = [64, 128], strides = [1, 1]} : vector<128x128xf32> to vector<64x128xf32>
    %105 = vector.extract_strided_slice %103 {offsets = [64, 0], sizes = [64, 128], strides = [1, 1]} : vector<128x128xf32> to vector<64x128xf32>
    %106 = arith.mulf %104, %105 : vector<64x128xf32>
    %107 = vector.extract_strided_slice %106 {offsets = [0, 0], sizes = [32, 128], strides = [1, 1]} : vector<64x128xf32> to vector<32x128xf32>
    %108 = vector.extract_strided_slice %106 {offsets = [32, 0], sizes = [32, 128], strides = [1, 1]} : vector<64x128xf32> to vector<32x128xf32>
    %109 = arith.mulf %107, %108 : vector<32x128xf32>
    %110 = vector.extract_strided_slice %109 {offsets = [0, 0], sizes = [16, 128], strides = [1, 1]} : vector<32x128xf32> to vector<16x128xf32>
    %111 = vector.extract_strided_slice %109 {offsets = [16, 0], sizes = [16, 128], strides = [1, 1]} : vector<32x128xf32> to vector<16x128xf32>
    %112 = arith.mulf %110, %111 : vector<16x128xf32>
    %113 = vector.extract_strided_slice %112 {offsets = [0, 0], sizes = [8, 128], strides = [1, 1]} : vector<16x128xf32> to vector<8x128xf32>
    %114 = vector.extract_strided_slice %112 {offsets = [8, 0], sizes = [8, 128], strides = [1, 1]} : vector<16x128xf32> to vector<8x128xf32>
    %115 = arith.mulf %113, %114 : vector<8x128xf32>
    %c4_i32_26 = arith.constant 4 : i32
    %116 = tpu.dynamic_rotate %115 by %c4_i32_26 dim 0 : vector<8x128xf32>, i32 -> vector<8x128xf32>
    %117 = arith.mulf %115, %116 : vector<8x128xf32>
    %c2_i32_27 = arith.constant 2 : i32
    %118 = tpu.dynamic_rotate %117 by %c2_i32_27 dim 0 : vector<8x128xf32>, i32 -> vector<8x128xf32>
    %119 = arith.mulf %117, %118 : vector<8x128xf32>
    %c1_i32_28 = arith.constant 1 : i32
    %120 = tpu.dynamic_rotate %119 by %c1_i32_28 dim 0 : vector<8x128xf32>, i32 -> vector<8x128xf32>
    %121 = arith.mulf %119, %120 : vector<8x128xf32>
    %122 = vector.extract_strided_slice %121 {offsets = [0, 0], sizes = [1, 128], strides = [1, 1]} : vector<8x128xf32> to vector<1x128xf32>
    %cst_29 = arith.constant dense<0.000000e+00> : vector<128x1xf32>
    %123 = tpu.matmul %4, %122, %cst_29 {dimension_numbers = #tpu.dot_dimension_numbers<[1], [1], [0], [0], [0, 0, 1, 0], [], []>} : vector<128x128xf32>, vector<1x128xf32>, vector<128x1xf32> -> vector<128x1xf32>
    %124 = arith.mulf %94, %123 : vector<128x1xf32>
    %cst_30 = arith.constant 1.000000e+00 : f32
    %125 = vector.broadcast %cst_30 : f32 to vector<128x1xf32>
    %126 = arith.subf %125, %123 : vector<128x1xf32>
    %127 = arith.mulf %94, %126 : vector<128x1xf32>
    %128 = arith.addf %98, %97 : vector<128x1xf32>
    %c0_31 = arith.constant 0 : index
    %c0_32 = arith.constant 0 : index
    %129 = vector.load %arg2[%c0_31, %c0_32] : memref<128x1xf32, #tpu.memory_space<vmem>>, vector<128x1xf32>
    tpu.vector_store %arg2[%c0_31, %c0_32], %124 {strides = array<i32>} : memref<128x1xf32, #tpu.memory_space<vmem>>, vector<128x1xf32>,
    %c0_33 = arith.constant 0 : index
    %c0_34 = arith.constant 0 : index
    %130 = vector.load %arg3[%c0_33, %c0_34] : memref<128x1xf32, #tpu.memory_space<vmem>>, vector<128x1xf32>
    tpu.vector_store %arg3[%c0_33, %c0_34], %127 {strides = array<i32>} : memref<128x1xf32, #tpu.memory_space<vmem>>, vector<128x1xf32>,
    %c0_35 = arith.constant 0 : index
    %c0_36 = arith.constant 0 : index
    %131 = vector.load %arg4[%c0_35, %c0_36] : memref<128x1xf32, #tpu.memory_space<vmem>>, vector<128x1xf32>
    tpu.vector_store %arg4[%c0_35, %c0_36], %128 {strides = array<i32>} : memref<128x1xf32, #tpu.memory_space<vmem>>, vector<128x1xf32>,
    return
  }
}

</mosaic_0001>

<bundles_post_ra>
// kernel: tpu_custom_call.1
= control target key start
LH: loop header
LB: loop body
LE: loop exit
PB: predicated region body
PF: predicated region fallthrough
CT: control target
= control target key end

     0   :  { %v1211_v0 = vmov 0   ;;  %s2220_s1 = inlined_call_operand.vmem [shape: f32[128,1], index: 1, kind: input, shape index: {}]   ;;  %s2221_s0 = inlined_call_operand.vmem [shape: f32[128,128], index: 0, kind: input, shape index: {}]   ;;  %s2222_s4 = inlined_call_operand.vmem [shape: f32[128,1], index: 4, kind: output, shape index: {2}]   ;;  %s2223_s2 = inlined_call_operand.vmem [shape: f32[128,1], index: 2, kind: output, shape index: {0}]   ;;  %s2224_s3 = inlined_call_operand.vmem [shape: f32[128,1], index: 3, kind: output, shape index: {1}]  }
   0x1   :  { %1194 = vset.pattern.permute.xlu2 %v1211_v0  ;;  %1193 = vset.pattern.permute.xlu1 %v1211_v0  ;;  %v1241_v1 = vld [vmem:[%s2220_s1 + $0x20] sm:$0xff]  ;;  %v1246_v2 = vld [vmem:[%s2220_s1 + $0x10] sm:$0xff]  ;;  %v1259_v4 = vld [vmem:[%s2220_s1 + $0x28] sm:$0xff] }
   0x2   :  { %2300 = vst [vmem:[#allocation2_spill] sm:$0xff] %v1241_v1  ;;  %v1251_v3 = vld [vmem:[%s2220_s1] sm:$0xff]  ;;  %1192 = vset.pattern.permute.xlu0 %v1211_v0  ;;  %151 = vperm.xlu2 %1194, %v1241_v1   ;;  %v1264_v5 = vld [vmem:[%s2220_s1 + $0x18] sm:$0xff]  ;;  %v1269_v6 = vld [vmem:[%s2220_s1 + $0x8] sm:$0xff] }
   0x3   :  { %141 = vperm.xlu1 %1193, %v1246_v2   ;;  %131 = vperm.xlu0 %1192, %v1251_v3   ;;  %2301 = vst [vmem:[#allocation3_spill] sm:$0xff] %v1259_v4  ;;  %v1277_v7 = vld [vmem:[%s2220_s1 + $0x40] sm:$0xff]  ;;  %v1282_v8 = vld [vmem:[%s2220_s1 + $0x38] sm:$0xff]  ;;  %v1287_v9 = vld [vmem:[%s2220_s1 + $0x30] sm:$0xff] }
   0x4   :  { %2302 = vst [vmem:[#allocation4_spill] sm:$0xff] %v1264_v5  ;;  %v1295_v10 = vld [vmem:[%s2220_s1 + $0x58] sm:$0xff]  ;;  %v1300_v11 = vld [vmem:[%s2220_s1 + $0x50] sm:$0xff]  ;;  %v1305_v12 = vld [vmem:[%s2220_s1 + $0x48] sm:$0xff] }
   0x5   :  { %2303 = vst [vmem:[#allocation5_spill] sm:$0xff] %v1277_v7  ;;  %v1313_v13 = vld [vmem:[%s2220_s1 + $0x70] sm:$0xff]  ;;  %v1318_v14 = vld [vmem:[%s2220_s1 + $0x68] sm:$0xff]  ;;  %v1323_v15 = vld [vmem:[%s2220_s1 + $0x60] sm:$0xff] }
   0x6   :  { %2304 = vst [vmem:[#allocation6_spill] sm:$0xff] %v1282_v8  ;;  %v1331_v16 = vld [vmem:[%s2220_s1 + $0x78] sm:$0xff]  ;;  %v1337_v29 = vld [vmem:[%s2221_s0 + $0x60] sm:$0xff]  ;;  %v1357_v33 = vld [vmem:[%s2221_s0 + $0x28] sm:$0xff] }
   0x7   :  { %2305 = vst [vmem:[#allocation7_spill] sm:$0xff] %v1287_v9  ;;  %v1342_v30 = vld [vmem:[%s2221_s0 + $0x20] sm:$0xff]  ;;  %v1362_v34 = vld [vmem:[%s2221_s0 + $0x50] sm:$0xff]  ;;  %v1367_v36 = vld [vmem:[%s2221_s0 + $0x68] sm:$0xff] }
   0x8   :  { %2306 = vst [vmem:[#allocation8_spill] sm:$0xff] %v1295_v10  ;;  %v1347_v31 = vld [vmem:[%s2221_s0 + $0x40] sm:$0xff]  ;;  %v1372_v38 = vld [vmem:[%s2221_s0 + $0x58] sm:$0xff]  ;;  %v1377_v39 = vld [vmem:[%s2221_s0 + $0x10] sm:$0xff] }
   0x9   :  { %2307 = vst [vmem:[#allocation9_spill] sm:$0xff] %v1300_v11  ;;  %v1352_v32 = vld [vmem:[%s2221_s0] sm:$0xff]  ;;  %v1382_v40 = vld [vmem:[%s2221_s0 + $0x18] sm:$0xff]  ;;  %v1390_v44 = vld [vmem:[%s2221_s0 + $0x30] sm:$0xff] }
   0xa   :  { %156 = vperm.xlu2 %1194, %v1259_v4   ;;  %2308 = vst [vmem:[#allocation10_spill] sm:$0xff] %v1305_v12  ;;  %v1395_v45 = vld [vmem:[%s2221_s0 + $0x48] sm:$0xff]  ;;  %v1401_v48 = vld [vmem:[%s2221_s0 + $0x70] sm:$0xff]  ;;  %v1417_v56 = vld [vmem:[%s2221_s0 + $0x38] sm:$0xff] }
   0xb   :  { %146 = vperm.xlu1 %1193, %v1264_v5   ;;  %136 = vperm.xlu0 %1192, %v1269_v6   ;;  %2309 = vst [vmem:[#allocation11_spill] sm:$0xff] %v1313_v13  ;;  %v1406_v49 = vld [vmem:[%s2221_s0 + $0x8] sm:$0xff]  ;;  %v1426_v0 = vld [vmem:[%s2221_s0 + $0x78] sm:$0xff] }
   0xc   :  { %2310 = vst [vmem:[#allocation12_spill] sm:$0xff] %v1318_v14 }
   0xd   :  { %2311 = vst [vmem:[#allocation13_spill] sm:$0xff] %v1323_v15 }
   0xe   :  { %2312 = vst [vmem:[#allocation14_spill] sm:$0xff] %v1331_v16 }
   0xf   :  { %2313 = vst [vmem:[#allocation15_spill] sm:$0xff] %v1337_v29 }
  0x10   :  { %2314 = vst [vmem:[#allocation16_spill] sm:$0xff] %v1342_v30 }
  0x11   :  { %2315 = vst [vmem:[#allocation17_spill] sm:$0xff] %v1347_v31 }
  0x12   :  { %171 = vperm.xlu2 %1194, %v1277_v7   ;;  %2316 = vst [vmem:[#allocation18_spill] sm:$0xff] %v1357_v33 }
  0x13   :  { %166 = vperm.xlu1 %1193, %v1282_v8   ;;  %161 = vperm.xlu0 %1192, %v1287_v9   ;;  %2317 = vst [vmem:[#allocation19_spill] sm:$0xff] %v1362_v34 }
  0x14   :  { %2318 = vst [vmem:[#allocation20_spill] sm:$0xff] %v1367_v36 }
  0x15   :  { %2319 = vst [vmem:[#allocation21_spill] sm:$0xff] %v1372_v38 }
  0x16   :  { %2320 = vst [vmem:[#allocation22_spill] sm:$0xff] %v1377_v39 }
  0x17   :  { %2321 = vst [vmem:[#allocation23_spill] sm:$0xff] %v1382_v40 }
  0x18   :  { %2322 = vst [vmem:[#allocation24_spill] sm:$0xff] %v1390_v44 }
  0x19   :  { %2323 = vst [vmem:[#allocation25_spill] sm:$0xff] %v1395_v45 }
  0x1a   :  { %186 = vperm.xlu2 %1194, %v1295_v10   ;;  %2324 = vst [vmem:[#allocation26_spill] sm:$0xff] %v1401_v48 }
  0x1b   :  { %181 = vperm.xlu1 %1193, %v1300_v11   ;;  %176 = vperm.xlu0 %1192, %v1305_v12   ;;  %2325 = vst [vmem:[#allocation27_spill] sm:$0xff] %v1406_v49 }
  0x1c   :  { %2326 = vst [vmem:[#allocation28_spill] sm:$0xff] %v1417_v56 }
  0x22   :  { %201 = vperm.xlu2 %1194, %v1313_v13  }
  0x23   :  { %196 = vperm.xlu1 %1193, %v1318_v14   ;;  %191 = vperm.xlu0 %1192, %v1323_v15  }
  0x2b   :  { %206 = vperm.xlu0 %1192, %v1331_v16  }
  0x5c   :  { %v152_v17 = vpop.permute.xlu2 %151 }
  0x5d   :  { %v213_v46 = vmul.f32 %v152_v17, %v1342_v30 }
  0x5f   :  { %v229_v17 = vsub.f32 1.0, %v213_v46 }
  0x64   :  { %v157_v20 = vpop.permute.xlu2 %156 }
  0x65   :  { %v214_v52 = vmul.f32 %v157_v20, %v1357_v33 }
  0x6c   :  { %v172_v23 = vpop.permute.xlu2 %171 }
  0x6d   :  { %v217_v42 = vmul.f32 %v172_v23, %v1347_v31 }
  0x6f   :  { %v233_v60 = vsub.f32 1.0, %v217_v42 }
  0x74   :  { %v187_v28 = vpop.permute.xlu2 %186 }
  0x75   :  { %v142_v18 = vpop.permute.xlu1 %141  ;;  %v132_v19 = vpop.permute.xlu0 %131  ;;  %v220_v53 = vmul.f32 %v187_v28, %v1372_v38 }
  0x76   :  { %v209_v43 = vmul.f32 %v132_v19, %v1352_v32  ;;  %v211_v54 = vmul.f32 %v142_v18, %v1377_v39 }
  0x77   :  { %v236_v23 = vsub.f32 1.0, %v220_v53 }
  0x78   :  { %v225_v61 = vsub.f32 1.0, %v209_v43 }
  0x7c   :  { %v202_v47 = vpop.permute.xlu2 %201 }
  0x7d   :  { %v147_v21 = vpop.permute.xlu1 %146  ;;  %v137_v22 = vpop.permute.xlu0 %136  ;;  %v223_v62 = vmul.f32 %v202_v47, %v1401_v48 }
  0x7e   :  { %v212_v55 = vmul.f32 %v147_v21, %v1382_v40  ;;  %v210_v63 = vmul.f32 %v137_v22, %v1406_v49  ;;  %v230_v21 = vsub.f32 1.0, %v214_v52 }
  0x7f   :  { %v239_v42 = vsub.f32 1.0, %v223_v62 }
  0x80   :  { %v226_v43 = vsub.f32 1.0, %v210_v63 }
  0x85   :  { %v167_v24 = vpop.permute.xlu1 %166  ;;  %v162_v25 = vpop.permute.xlu0 %161 }
  0x86   :  { %v215_v57 = vmul.f32 %v162_v25, %v1390_v44  ;;  %v216_v18 = vmul.f32 %v167_v24, %v1417_v56  ;;  %v227_v25 = vsub.f32 1.0, %v211_v54 }
  0x88   :  { %v231_v28 = vsub.f32 1.0, %v215_v57  ;;  %v232_v47 = vsub.f32 1.0, %v216_v18  ;;  %v14_v57 = vlaneseq }
  0x8a   :  { %v1433_v63 = vand.u32 127, %v14_v57 }
  0x8d   :  { %v182_v26 = vpop.permute.xlu1 %181  ;;  %v177_v27 = vpop.permute.xlu0 %176 }
  0x8e   :  { %v219_v50 = vmul.f32 %v182_v26, %v1362_v34  ;;  %v218_v58 = vmul.f32 %v177_v27, %v1395_v45  ;;  %v228_v26 = vsub.f32 1.0, %v212_v55 }
  0x90   :  { %v235_v19 = vsub.f32 1.0, %v219_v50  ;;  %v244_v24 = vmul.f32 %v236_v23, %v228_v26  ;;  %v247_v50 = vmul.f32 %v239_v42, %v231_v28 }
  0x92   :  { %v243_v49 = vmul.f32 %v235_v19, %v227_v25 }
  0x94   :  { %v251_v54 = vmul.f32 %v247_v50, %v243_v49 }
  0x95   :  { %v197_v35 = vpop.permute.xlu1 %196  ;;  %v192_v37 = vpop.permute.xlu0 %191 }
  0x96   :  { %v221_v41 = vmul.f32 %v192_v37, %v1337_v29  ;;  %v222_v51 = vmul.f32 %v197_v35, %v1367_v36  ;;  %v234_v35 = vsub.f32 1.0, %v218_v58 }
  0x98   :  { %v237_v59 = vsub.f32 1.0, %v221_v41  ;;  %v238_v20 = vsub.f32 1.0, %v222_v51  ;;  %v241_v41 = vmul.f32 %v233_v60, %v225_v61  ;;  %v242_v51 = vmul.f32 %v234_v35, %v226_v43 }
  0x9a   :  { %v245_v37 = vmul.f32 %v237_v59, %v229_v17  ;;  %v246_v46 = vmul.f32 %v238_v20, %v230_v21 }
  0x9c   :  { %v249_v52 = vmul.f32 %v245_v37, %v241_v41  ;;  %v250_v55 = vmul.f32 %v246_v46, %v242_v51 }
  0x9d   :  { %v207_v27 = vpop.permute.xlu0 %206 }
  0x9e   :  { %v224_v22 = vmul.f32 %v207_v27, %v1426_v0  ;;  %v253_v58 = vmul.f32 %v251_v54, %v249_v52  ;;  %v1430_v27 = vshrl.u32 %v14_v57, 7 }
  0xa0   :  { %v240_v45 = vsub.f32 1.0, %v224_v22  ;;  %v17_v62 = vadd.s32 16, %v1430_v27  ;;  %v16_v19 = vadd.s32 8, %v1430_v27  ;;  %vm33_vm2 = vcmp.eq.s32.totalorder %v1430_v27, %v1433_v63 }
  0xa1   :  { %v21_v28 = vadd.s32 48, %v1430_v27  ;;  %v18_v35 = vadd.s32 24, %v1430_v27  ;;  %v19_v37 = vadd.s32 32, %v1430_v27  ;;  %v20_v50 = vadd.s32 40, %v1430_v27 }
  0xa2   :  { %v248_v53 = vmul.f32 %v240_v45, %v232_v47  ;;  %vm35_vm0 = vcmp.eq.s32.totalorder %v17_v62, %v1433_v63  ;;  %vm34_vm1 = vcmp.eq.s32.totalorder %v16_v19, %v1433_v63  ;;  %v22_v51 = vadd.s32 56, %v1430_v27 }
  0xa3   :  { %vm39_vm3 = vcmp.eq.s32.totalorder %v21_v28, %v1433_v63  ;;  %vm36_vm4 = vcmp.eq.s32.totalorder %v18_v35, %v1433_v63  ;;  %vm37_vm5 = vcmp.eq.s32.totalorder %v19_v37, %v1433_v63  ;;  %vm38_vm7 = vcmp.eq.s32.totalorder %v20_v50, %v1433_v63 }
  0xa4   :  { %v252_v56 = vmul.f32 %v248_v53, %v244_v24  ;;  %v24_v24 = vadd.s32 72, %v1430_v27  ;;  %vm40_vm8 = vcmp.eq.s32.totalorder %v22_v51, %v1433_v63  ;;  %v26_v28 = vadd.s32 88, %v1430_v27 }
  0xa5   :  { %v28_v35 = vadd.s32 104, %v1430_v27  ;;  %v29_v51 = vadd.s32 112, %v1430_v27 }
  0xa6   :  { %v254_v59 = vmul.f32 %v252_v56, %v250_v55  ;;  %v1212_v56 = vmov 0.0   ;;  %vm42_vm6 = vcmp.eq.s32.totalorder %v24_v24, %v1433_v63  ;;  %vm44_vm13 = vcmp.eq.s32.totalorder %v26_v28, %v1433_v63 }
  0xa7   :  { %v1441_v21 = vsel %vm35_vm0, 1.0, %v1212_v56  ;;  %v1444_v23 = vsel %vm34_vm1, 1.0, %v1212_v56  ;;  %v1447_v25 = vsel %vm33_vm2, 1.0, %v1212_v56  ;;  %v1464_v43 = vsel %vm39_vm3, 1.0, %v1212_v56 }
  0xa8   :  { %v255_v17 = vmul.f32 %v254_v59, %v253_v58  ;;  %v1467_v47 = vsel %vm36_vm4, 1.0, %v1212_v56  ;;  %v1470_v46 = vsel %vm37_vm5, 1.0, %v1212_v56  ;;  %v1485_v55 = vsel %vm42_vm6, 1.0, %v1212_v56 }
  0xa9   :  { %v1488_v57 = vsel %vm38_vm7, 1.0, %v1212_v56  ;;  %v1491_v58 = vsel %vm40_vm8, 1.0, %v1212_v56  ;;  %v27_v59 = vadd.s32 96, %v1430_v27  ;;  %vm46_vm14 = vcmp.eq.s32.totalorder %v28_v35, %v1433_v63 }
  0xaa   :  { %v256_v60 = vrot.slane %v255_v17, 4  ;;  %v1530_v24 = vsel %vm44_vm13, 1.0, %v1212_v56  ;;  %v1533_v50 = vsel %vm46_vm14, 1.0, %v1212_v56  ;;  %vm47_vm15 = vcmp.eq.s32.totalorder %v29_v51, %v1433_v63 }
  0xab   :  { %vm45_vm9 = vcmp.eq.s32.totalorder %v27_v59, %v1433_v63  ;;  %v1544_v59 = vsel %vm47_vm15, 1.0, %v1212_v56  ;;  %vm1113_vm0 = vcmask 7168  }
  0xac   :  { %v257_v61 = vmul.f32 %v256_v60, %v255_v17  ;;  %v23_v17 = vadd.s32 64, %v1430_v27  ;;  %v25_v60 = vadd.s32 80, %v1430_v27  ;;  %v1506_v19 = vsel %vm45_vm9, 1.0, %v1212_v56 }
  0xae   :  { %v258_v18 = vrot.slane %v257_v61, 6  ;;  %vm41_vm10 = vcmp.eq.s32.totalorder %v23_v17, %v1433_v63  ;;  %vm43_vm11 = vcmp.eq.s32.totalorder %v25_v60, %v1433_v63  ;;  %v99_v17 = vsub.f32 1.0, %v1246_v2 }
  0xaf   :  { %v98_v60 = vsub.f32 1.0, %v1269_v6 }
  0xb0   :  { %v259_v20 = vmul.f32 %v258_v18, %v257_v61 }
  0xb2   :  { %v260_v45 = vrot.slane %v259_v20, 7 }
  0xb4   :  { %v261_v49 = vmul.f32 %v260_v45, %v259_v20  ;;  %v1509_v20 = vsel %vm41_vm10, 1.0, %v1212_v56  ;;  %v1512_v45 = vsel %vm43_vm11, 1.0, %v1212_v56 }
  0xb6   :  { %v1449_v26 = vperm.slane %v261_v49, 0  ;;  %v30_v49 = vadd.s32 120, %v1430_v27 }
  0xb8   :  { %v265_v22 = vmul.f32 %v1441_v21, %v1449_v26  ;;  %v264_v41 = vmul.f32 %v1444_v23, %v1449_v26  ;;  %v263_v42 = vmul.f32 %v1447_v25, %v1449_v26  ;;  %v269_v52 = vmul.f32 %v1464_v43, %v1449_v26 }
  0xb9   :  { %v266_v53 = vmul.f32 %v1467_v47, %v1449_v26  ;;  %v267_v54 = vmul.f32 %v1470_v46, %v1449_v26  ;;  %v272_v61 = vmul.f32 %v1485_v55, %v1449_v26  ;;  %v268_v62 = vmul.f32 %v1488_v57, %v1449_v26 }
  0xba   :  { %283 = vadd.xlane.f32.xlu0 %v265_v22  ;;  %281 = vadd.xlane.f32.xlu2 %v264_v41  ;;  %v270_v18 = vmul.f32 %v1491_v58, %v1449_v26  ;;  %v275_v37 = vmul.f32 %v1506_v19, %v1449_v26  ;;  %v271_v22 = vmul.f32 %v1509_v20, %v1449_v26 }
  0xbb   :  { %279 = vadd.xlane.f32.xlu1 %v263_v42  ;;  %v273_v41 = vmul.f32 %v1512_v45, %v1449_v26  ;;  %vm48_vm12 = vcmp.eq.s32.totalorder %v30_v49, %v1433_v63  ;;  %v277_v27 = vmul.f32 %v1544_v59, %v1449_v26 }
  0xbc   :  { %v1527_v42 = vsel %vm48_vm12, 1.0, %v1212_v56 }
  0xc2   :  { %291 = vadd.xlane.f32.xlu0 %v269_v52  ;;  %285 = vadd.xlane.f32.xlu2 %v266_v53  ;;  %v278_v52 = vmul.f32 %v1527_v42, %v1449_v26  ;;  %v274_v53 = vmul.f32 %v1530_v24, %v1449_v26 }
  0xc3   :  { %287 = vadd.xlane.f32.xlu1 %v267_v54  ;;  %v276_v54 = vmul.f32 %v1533_v50, %v1449_v26 }
  0xca   :  { %297 = vadd.xlane.f32.xlu0 %v272_v61  ;;  %289 = vadd.xlane.f32.xlu2 %v268_v62  ;;  %v97_v61 = vsub.f32 1.0, %v1251_v3 }
  0xcb   :  { %293 = vadd.xlane.f32.xlu1 %v270_v18 }
  0xd2   :  { %303 = vadd.xlane.f32.xlu0 %v275_v37  ;;  %295 = vadd.xlane.f32.xlu2 %v271_v22 }
  0xd3   :  { %299 = vadd.xlane.f32.xlu1 %v273_v41 }
  0xda   :  { %309 = vadd.xlane.f32.xlu0 %v278_v52  ;;  %301 = vadd.xlane.f32.xlu2 %v274_v53  ;;  %v103_v52 = vsub.f32 1.0, %v1287_v9  ;;  %v100_v53 = vsub.f32 1.0, %v1264_v5  ;;  %v106_v9 = vsub.f32 1.0, %v1305_v12  ;;  %v102_v5 = vsub.f32 1.0, %v1259_v4 }
  0xdb   :  { %305 = vadd.xlane.f32.xlu1 %v276_v54  ;;  %v101_v54 = vsub.f32 1.0, %v1241_v1 }
  0xe2   :  { %307 = vadd.xlane.f32.xlu2 %v277_v27 }
 0x12d   :  { %v284_v62 = vpop.xlane.xlu0 %283  ;;  %v282_v18 = vpop.xlane.xlu2 %281 }
 0x12e   :  { %v1551_v49 = vmul.f32 %v284_v62, %v99_v17  ;;  %v329_v28 = vsub.f32 1.0, %v284_v62  ;;  %v1553_v63 = vmul.f32 %v282_v18, %v98_v60  ;;  %v328_v35 = vsub.f32 1.0, %v282_v18  ;;  %v280_v56 = vpop.xlane.xlu1 %279 }
 0x12f   :  { %v1555_v37 = vmul.f32 %v280_v56, %v97_v61  ;;  %v327_v22 = vsub.f32 1.0, %v280_v56 }
 0x130   :  { %v1557_v26 = vmul.f32 %v329_v28, %v99_v17  ;;  %v1559_v41 = vmul.f32 %v328_v35, %v98_v60 }
 0x131   :  { %v1561_v51 = vmul.f32 %v327_v22, %v97_v61 }
 0x132   :  { %387 = vperm.xlu0 %1192, %v1557_v26   ;;  %382 = vperm.xlu2 %1194, %v1559_v41  }
 0x133   :  { %2327 = vst [vmem:[#allocation29_spill] sm:$0xff] %v1561_v51  ;;  %377 = vperm.xlu1 %1193, %v1561_v51  }
 0x135   :  { %v292_v27 = vpop.xlane.xlu0 %291  ;;  %v286_v62 = vpop.xlane.xlu2 %285 }
 0x136   :  { %v1569_v17 = vmul.f32 %v292_v27, %v103_v52  ;;  %v1571_v60 = vmul.f32 %v286_v62, %v100_v53  ;;  %v330_v61 = vsub.f32 1.0, %v286_v62  ;;  %v288_v18 = vpop.xlane.xlu1 %287  ;;  %v333_v1 = vsub.f32 1.0, %v292_v27 }
 0x137   :  { %v1573_v28 = vmul.f32 %v288_v18, %v101_v54  ;;  %v331_v35 = vsub.f32 1.0, %v288_v18  ;;  %v109_v27 = vsub.f32 1.0, %v1323_v15 }
 0x138   :  { %2328 = vst [vmem:[#allocation30_spill] sm:$0xff] %v1569_v17  ;;  %v1575_v56 = vmul.f32 %v330_v61, %v100_v53  ;;  %v104_v17 = vsub.f32 1.0, %v1282_v8  ;;  %v1592_v4 = vmul.f32 %v333_v1, %v103_v52  ;;  %v105_v8 = vsub.f32 1.0, %v1277_v7 }
 0x139   :  { %2329 = vst [vmem:[#allocation31_spill] sm:$0xff] %v1571_v60  ;;  %v1577_v22 = vmul.f32 %v331_v35, %v101_v54 }
 0x13a   :  { %2330 = vst [vmem:[#allocation32_spill] sm:$0xff] %v1575_v56 }
 0x13b   :  { %2331 = vst [vmem:[#allocation33_spill] sm:$0xff] %v1577_v22  ;;  %392 = vperm.xlu1 %1193, %v1575_v56   ;;  %397 = vperm.xlu0 %1192, %v1577_v22  }
 0x13c   :  { %2335 = vst [vmem:[#allocation37_spill] sm:$0xff] %v1592_v4 }
 0x13d   :  { %v298_v62 = vpop.xlane.xlu0 %297  ;;  %v290_v60 = vpop.xlane.xlu2 %289 }
 0x13e   :  { %v1584_v51 = vmul.f32 %v298_v62, %v106_v9  ;;  %v1586_v18 = vmul.f32 %v290_v60, %v102_v5  ;;  %v332_v53 = vsub.f32 1.0, %v290_v60  ;;  %v294_v54 = vpop.xlane.xlu1 %293  ;;  %v107_v60 = vsub.f32 1.0, %v1300_v11 }
 0x13f   :  { %v1588_v61 = vmul.f32 %v294_v54, %v104_v17  ;;  %v334_v35 = vsub.f32 1.0, %v294_v54 }
 0x140   :  { %2332 = vst [vmem:[#allocation34_spill] sm:$0xff] %v1584_v51  ;;  %v1590_v12 = vmul.f32 %v332_v53, %v102_v5  ;;  %v336_v51 = vsub.f32 1.0, %v298_v62  ;;  %v108_v62 = vsub.f32 1.0, %v1295_v10 }
 0x141   :  { %2333 = vst [vmem:[#allocation35_spill] sm:$0xff] %v1588_v61  ;;  %v1594_v56 = vmul.f32 %v334_v35, %v104_v17 }
 0x142   :  { %2334 = vst [vmem:[#allocation36_spill] sm:$0xff] %v1590_v12  ;;  %402 = vperm.xlu2 %1194, %v1590_v12   ;;  %v1610_v7 = vmul.f32 %v336_v51, %v106_v9 }
 0x143   :  { %2336 = vst [vmem:[#allocation38_spill] sm:$0xff] %v1594_v56  ;;  %407 = vperm.xlu1 %1193, %v1592_v4   ;;  %412 = vperm.xlu0 %1192, %v1594_v56  }
 0x144   :  { %2341 = vst [vmem:[#allocation43_spill] sm:$0xff] %v1610_v7 }
 0x145   :  { %v304_v54 = vpop.xlane.xlu0 %303  ;;  %v296_v5 = vpop.xlane.xlu2 %295 }
 0x146   :  { %v1602_v53 = vmul.f32 %v304_v54, %v109_v27  ;;  %v1604_v1 = vmul.f32 %v296_v5, %v105_v8  ;;  %v335_v52 = vsub.f32 1.0, %v296_v5  ;;  %v300_v17 = vpop.xlane.xlu1 %299 }
 0x147   :  { %v1606_v35 = vmul.f32 %v300_v17, %v107_v60  ;;  %v337_v15 = vsub.f32 1.0, %v300_v17 }
 0x148   :  { %2337 = vst [vmem:[#allocation39_spill] sm:$0xff] %v1602_v53  ;;  %v1608_v61 = vmul.f32 %v335_v52, %v105_v8  ;;  %v339_v53 = vsub.f32 1.0, %v304_v54  ;;  %v2249_v8 = vsub.f32 1.0, %v1318_v14  ;;  %v111_v54 = vsub.f32 1.0, %v1313_v13 }
 0x149   :  { %2338 = vst [vmem:[#allocation40_spill] sm:$0xff] %v1604_v1  ;;  %v1612_v4 = vmul.f32 %v337_v15, %v107_v60 }
 0x14a   :  { %2339 = vst [vmem:[#allocation41_spill] sm:$0xff] %v1606_v35  ;;  %417 = vperm.xlu2 %1194, %v1608_v61   ;;  %v1626_v51 = vmul.f32 %v339_v53, %v109_v27  ;;  %v2263_v53 = vsub.f32 1.0, %v1331_v16 }
 0x14b   :  { %2340 = vst [vmem:[#allocation42_spill] sm:$0xff] %v1608_v61  ;;  %422 = vperm.xlu1 %1193, %v1610_v7   ;;  %427 = vperm.xlu0 %1192, %v1612_v4  }
 0x14c   :  { %2342 = vst [vmem:[#allocation44_spill] sm:$0xff] %v1612_v4 }
 0x14d   :  { %v302_v5 = vpop.xlane.xlu2 %301  ;;  %2346 = vst [vmem:[#allocation48_spill] sm:$0xff] %v1626_v51  ;;  %v1632_v52 = vpop.xlane.xlu0 %309 }
 0x14e   :  { %v1618_v11 = vmul.f32 %v302_v5, %v108_v62  ;;  %v338_v35 = vsub.f32 1.0, %v302_v5  ;;  %v1620_v17 = vpop.xlane.xlu1 %305  ;;  %2348 = vst [vmem:[#allocation50_spill] sm:$0xff] %v1632_v52  ;;  %v342_v5 = vsub.f32 1.0, %v1632_v52 }
 0x14f   :  { %2344 = vst [vmem:[#allocation46_spill] sm:$0xff] %v1620_v17  ;;  %v340_v9 = vsub.f32 1.0, %v1620_v17 }
 0x150   :  { %2343 = vst [vmem:[#allocation45_spill] sm:$0xff] %v1618_v11  ;;  %v1624_v15 = vmul.f32 %v338_v35, %v108_v62 }
 0x151   :  { %v1630_v60 = vmul.f32 %v340_v9, %v2249_v8  ;;  %v1646_v8 = vmul.f32 %v342_v5, %v2263_v53 }
 0x152   :  { %2345 = vst [vmem:[#allocation47_spill] sm:$0xff] %v1624_v15  ;;  %432 = vperm.xlu2 %1194, %v1624_v15  }
 0x153   :  { %2347 = vst [vmem:[#allocation49_spill] sm:$0xff] %v1630_v60  ;;  %437 = vperm.xlu1 %1193, %v1626_v51   ;;  %442 = vperm.xlu0 %1192, %v1630_v60  }
 0x154   :  { %2351 = vst [vmem:[#allocation53_spill] sm:$0xff] %v1646_v8 }
 0x155   :  { %v308_v35 = vpop.xlane.xlu2 %307 }
 0x156   :  { %v1639_v62 = vmul.f32 %v308_v35, %v111_v54  ;;  %v341_v27 = vsub.f32 1.0, %v308_v35 }
 0x158   :  { %2349 = vst [vmem:[#allocation51_spill] sm:$0xff] %v1639_v62  ;;  %v1642_v9 = vmul.f32 %v341_v27, %v111_v54 }
 0x15a   :  { %2350 = vst [vmem:[#allocation52_spill] sm:$0xff] %v1642_v9  ;;  %447 = vperm.xlu2 %1194, %v1642_v9  }
 0x15b   :  { %452 = vperm.xlu1 %1193, %v1646_v8  }
 0x18c   :  { %v383_v51 = vpop.permute.xlu2 %382 }
 0x19c   :  { %v403_v52 = vpop.permute.xlu2 %402 }
 0x19d   :  { %v460_v9 = vmul.f32 %v403_v52, %v1357_v33  ;;  %v2352_v33 = vld [vmem:[#allocation25_spill] sm:$0xff] }
 0x1a4   :  { %v388_v13 = vpop.permute.xlu0 %387  ;;  %v418_v62 = vpop.permute.xlu2 %417 }
 0x1a5   :  { %v378_v60 = vpop.permute.xlu1 %377  ;;  %v463_v8 = vmul.f32 %v418_v62, %v1347_v31  ;;  %v457_v1 = vmul.f32 %v388_v13, %v1377_v39 }
 0x1a6   :  { %v455_v4 = vmul.f32 %v378_v60, %v1352_v32  ;;  %v2353_v60 = vld [vmem:[#allocation27_spill] sm:$0xff] }
 0x1a7   :  { %v456_v31 = vmul.f32 %v383_v51, %v2353_v60 }
 0x1ac   :  { %v433_v15 = vpop.permute.xlu2 %432 }
 0x1ad   :  { %v398_v17 = vpop.permute.xlu0 %397  ;;  %v393_v14 = vpop.permute.xlu1 %392  ;;  %v466_v12 = vmul.f32 %v433_v15, %v1372_v38  ;;  %v473_v15 = vsub.f32 1.0, %v457_v1 }
 0x1ae   :  { %v459_v11 = vmul.f32 %v398_v17, %v1342_v30  ;;  %v458_v22 = vmul.f32 %v393_v14, %v1382_v40  ;;  %v476_v17 = vsub.f32 1.0, %v460_v9  ;;  %v479_v30 = vsub.f32 1.0, %v463_v8 }
 0x1af   :  { %v482_v38 = vsub.f32 1.0, %v466_v12 }
 0x1b0   :  { %v474_v14 = vsub.f32 1.0, %v458_v22 }
 0x1b4   :  { %v448_v5 = vpop.permute.xlu2 %447 }
 0x1b5   :  { %v413_v35 = vpop.permute.xlu0 %412  ;;  %v408_v7 = vpop.permute.xlu1 %407 }
 0x1b6   :  { %v461_v52 = vmul.f32 %v408_v7, %v1390_v44 }
 0x1bd   :  { %v428_v54 = vpop.permute.xlu0 %427  ;;  %v423_v27 = vpop.permute.xlu1 %422 }
 0x1be   :  { %v465_v61 = vmul.f32 %v428_v54, %v1362_v34  ;;  %v464_v62 = vmul.f32 %v423_v27, %v2352_v33  ;;  %v471_v54 = vsub.f32 1.0, %v455_v4  ;;  %v475_v34 = vsub.f32 1.0, %v459_v11 }
 0x1bf   :  { %v472_v27 = vsub.f32 1.0, %v456_v31  ;;  %v490_v33 = vmul.f32 %v482_v38, %v474_v14 }
 0x1c0   :  { %v481_v13 = vsub.f32 1.0, %v465_v61  ;;  %v480_v7 = vsub.f32 1.0, %v464_v62  ;;  %v487_v51 = vmul.f32 %v479_v30, %v471_v54 }
 0x1c2   :  { %v489_v8 = vmul.f32 %v481_v13, %v473_v15  ;;  %v488_v61 = vmul.f32 %v480_v7, %v472_v27 }
 0x1c5   :  { %v443_v10 = vpop.permute.xlu0 %442  ;;  %v438_v16 = vpop.permute.xlu1 %437 }
 0x1c6   :  { %v467_v53 = vmul.f32 %v438_v16, %v1337_v29  ;;  %v468_v56 = vmul.f32 %v443_v10, %v1367_v36  ;;  %v469_v16 = vmul.f32 %v448_v5, %v1401_v48  ;;  %v2354_v10 = vld [vmem:[#allocation28_spill] sm:$0xff]  ;;  %v477_v48 = vsub.f32 1.0, %v461_v52 }
 0x1c7   :  { %v462_v36 = vmul.f32 %v413_v35, %v2354_v10 }
 0x1c8   :  { %v483_v29 = vsub.f32 1.0, %v467_v53  ;;  %v484_v39 = vsub.f32 1.0, %v468_v56  ;;  %v485_v40 = vsub.f32 1.0, %v469_v16 }
 0x1c9   :  { %v478_v9 = vsub.f32 1.0, %v462_v36 }
 0x1ca   :  { %v491_v44 = vmul.f32 %v483_v29, %v475_v34  ;;  %v492_v4 = vmul.f32 %v484_v39, %v476_v17  ;;  %v493_v35 = vmul.f32 %v485_v40, %v477_v48 }
 0x1cc   :  { %v495_v56 = vmul.f32 %v491_v44, %v487_v51  ;;  %v497_v12 = vmul.f32 %v493_v35, %v489_v8  ;;  %v496_v22 = vmul.f32 %v492_v4, %v488_v61 }
 0x1cd   :  { %v453_v5 = vpop.permute.xlu1 %452 }
 0x1ce   :  { %v470_v53 = vmul.f32 %v453_v5, %v1426_v0  ;;  %v499_v10 = vmul.f32 %v497_v12, %v495_v56 }
 0x1d0   :  { %v486_v11 = vsub.f32 1.0, %v470_v53 }
 0x1d2   :  { %v494_v1 = vmul.f32 %v486_v11, %v478_v9 }
 0x1d4   :  { %v498_v16 = vmul.f32 %v494_v1, %v490_v33 }
 0x1d6   :  { %v500_v52 = vmul.f32 %v498_v16, %v496_v22  ;;  %v607_v16 = vadd.f32 %v1557_v26, %v1246_v2 }
 0x1d8   :  { %v501_v62 = vmul.f32 %v500_v52, %v499_v10  ;;  %v606_v52 = vadd.f32 %v1559_v41, %v1269_v6  ;;  %v2356_v41 = vld [vmem:[#allocation31_spill] sm:$0xff] }
 0x1da   :  { %v502_v29 = vrot.slane %v501_v62, 4 }
 0x1dc   :  { %v503_v34 = vmul.f32 %v502_v29, %v501_v62 }
 0x1de   :  { %v504_v5 = vrot.slane %v503_v34, 6 }
 0x1e0   :  { %v505_v31 = vmul.f32 %v504_v5, %v503_v34  ;;  %v2355_v34 = vld [vmem:[#allocation29_spill] sm:$0xff] }
 0x1e1   :  { %v605_v5 = vadd.f32 %v2355_v34, %v1251_v3 }
 0x1e2   :  { %v506_v30 = vrot.slane %v505_v31, 7 }
 0x1e4   :  { %v507_v36 = vmul.f32 %v506_v30, %v505_v31 }
 0x1e6   :  { %v508_v54 = vperm.slane %v507_v36, 0 }
 0x1e8   :  { %v511_v39 = vmul.f32 %v1441_v21, %v508_v54  ;;  %v510_v38 = vmul.f32 %v1444_v23, %v508_v54  ;;  %v509_v40 = vmul.f32 %v1447_v25, %v508_v54  ;;  %v514_v33 = vmul.f32 %v1488_v57, %v508_v54 }
 0x1e9   :  { %v513_v44 = vmul.f32 %v1470_v46, %v508_v54  ;;  %v512_v48 = vmul.f32 %v1467_v47, %v508_v54  ;;  %v517_v17 = vmul.f32 %v1509_v20, %v508_v54  ;;  %v516_v10 = vmul.f32 %v1491_v58, %v508_v54 }
 0x1ea   :  { %529 = vadd.xlane.f32.xlu1 %v511_v39  ;;  %527 = vadd.xlane.f32.xlu2 %v510_v38  ;;  %v515_v13 = vmul.f32 %v1464_v43, %v508_v54  ;;  %v520_v15 = vmul.f32 %v1530_v24, %v508_v54  ;;  %v519_v14 = vmul.f32 %v1512_v45, %v508_v54 }
 0x1eb   :  { %525 = vadd.xlane.f32.xlu0 %v509_v40  ;;  %v518_v7 = vmul.f32 %v1485_v55, %v508_v54  ;;  %v523_v53 = vmul.f32 %v1544_v59, %v508_v54  ;;  %v522_v27 = vmul.f32 %v1533_v50, %v508_v54  ;;  %v521_v51 = vmul.f32 %v1506_v19, %v508_v54  ;;  %v2357_v40 = vld [vmem:[#allocation2_spill] sm:$0xff] }
 0x1ec   :  { %v524_v9 = vmul.f32 %v1527_v42, %v508_v54 }
 0x1f2   :  { %535 = vadd.xlane.f32.xlu1 %v514_v33  ;;  %533 = vadd.xlane.f32.xlu2 %v513_v44  ;;  %v2358_v33 = vld [vmem:[#allocation33_spill] sm:$0xff] }
 0x1f3   :  { %531 = vadd.xlane.f32.xlu0 %v512_v48  ;;  %v609_v44 = vadd.f32 %v2358_v33, %v2357_v40  ;;  %v2359_v48 = vld [vmem:[#allocation3_spill] sm:$0xff]  ;;  %v2375_v40 = vld [vmem:[#allocation37_spill] sm:$0xff] }
 0x1fa   :  { %541 = vadd.xlane.f32.xlu1 %v517_v17  ;;  %539 = vadd.xlane.f32.xlu2 %v516_v10  ;;  %v2360_v17 = vld [vmem:[#allocation36_spill] sm:$0xff] }
 0x1fb   :  { %537 = vadd.xlane.f32.xlu0 %v515_v13  ;;  %v610_v10 = vadd.f32 %v2360_v17, %v2359_v48 }
 0x202   :  { %547 = vadd.xlane.f32.xlu1 %v520_v15  ;;  %545 = vadd.xlane.f32.xlu2 %v519_v14  ;;  %v2361_v14 = vld [vmem:[#allocation4_spill] sm:$0xff] }
 0x203   :  { %543 = vadd.xlane.f32.xlu0 %v518_v7  ;;  %v2362_v7 = vld [vmem:[#allocation32_spill] sm:$0xff] }
 0x20a   :  { %553 = vadd.xlane.f32.xlu1 %v523_v53  ;;  %551 = vadd.xlane.f32.xlu2 %v522_v27  ;;  %v608_v53 = vadd.f32 %v2362_v7, %v2361_v14  ;;  %v2379_v14 = vld [vmem:[#allocation45_spill] sm:$0xff] }
 0x20b   :  { %549 = vadd.xlane.f32.xlu0 %v521_v51 }
 0x213   :  { %555 = vadd.xlane.f32.xlu0 %v524_v9 }
 0x25d   :  { %v530_v8 = vpop.xlane.xlu1 %529  ;;  %v528_v4 = vpop.xlane.xlu2 %527 }
 0x25e   :  { %v1683_v11 = vmul.f32 %v530_v8, %v1551_v49  ;;  %v575_v35 = vsub.f32 1.0, %v530_v8  ;;  %v1686_v61 = vmul.f32 %v528_v4, %v1553_v63  ;;  %v574_v56 = vsub.f32 1.0, %v528_v4  ;;  %v526_v1 = vpop.xlane.xlu0 %525 }
 0x25f   :  { %v1689_v12 = vmul.f32 %v526_v1, %v1555_v37  ;;  %v573_v22 = vsub.f32 1.0, %v526_v1  ;;  %v2366_v1 = vld [vmem:[#allocation35_spill] sm:$0xff] }
 0x260   :  { %v591_v62 = vmul.f32 %v575_v35, %v1551_v49  ;;  %v590_v29 = vmul.f32 %v574_v56, %v1553_v63  ;;  %v2364_v56 = vld [vmem:[#allocation40_spill] sm:$0xff] }
 0x261   :  { %v589_v31 = vmul.f32 %v573_v22, %v1555_v37 }
 0x262   :  { %v1700_v30 = vadd.f32 %v607_v16, %v591_v62  ;;  %v1702_v36 = vadd.f32 %v606_v52, %v590_v29  ;;  %628 = vperm.xlu1 %1193, %v590_v29   ;;  %633 = vperm.xlu0 %1192, %v591_v62   ;;  %v2368_v62 = vld [vmem:[#allocation30_spill] sm:$0xff] }
 0x263   :  { %v1704_v54 = vadd.f32 %v605_v5, %v589_v31  ;;  %623 = vperm.xlu2 %1194, %v589_v31   ;;  %v2370_v5 = vld [vmem:[#allocation6_spill] sm:$0xff] }
 0x264   :  { %v2371_v31 = vld [vmem:[#allocation38_spill] sm:$0xff] }
 0x265   :  { %v536_v2 = vpop.xlane.xlu1 %535  ;;  %v534_v6 = vpop.xlane.xlu2 %533 }
 0x266   :  { %v1707_v49 = vmul.f32 %v536_v2, %v1586_v18  ;;  %v578_v63 = vsub.f32 1.0, %v536_v2  ;;  %v1710_v26 = vmul.f32 %v534_v6, %v1573_v28  ;;  %v577_v3 = vsub.f32 1.0, %v534_v6  ;;  %v532_v37 = vpop.xlane.xlu0 %531  ;;  %v2372_v6 = vld [vmem:[#allocation5_spill] sm:$0xff] }
 0x267   :  { %v1713_v39 = vmul.f32 %v532_v37, %v2356_v41  ;;  %v576_v38 = vsub.f32 1.0, %v532_v37  ;;  %v612_v2 = vadd.f32 %v2371_v31, %v2370_v5  ;;  %v2387_v5 = vld [vmem:[#allocation8_spill] sm:$0xff]  ;;  %v2388_v31 = vld [vmem:[#allocation47_spill] sm:$0xff] }
 0x268   :  { %v594_v13 = vmul.f32 %v578_v63, %v1586_v18  ;;  %v593_v15 = vmul.f32 %v577_v3, %v1573_v28  ;;  %v2373_v63 = vld [vmem:[#allocation42_spill] sm:$0xff] }
 0x269   :  { %v592_v27 = vmul.f32 %v576_v38, %v2356_v41  ;;  %v613_v3 = vadd.f32 %v2373_v63, %v2372_v6  ;;  %v2374_v38 = vld [vmem:[#allocation7_spill] sm:$0xff] }
 0x26a   :  { %v1724_v51 = vadd.f32 %v610_v10, %v594_v13  ;;  %v1726_v9 = vadd.f32 %v609_v44, %v593_v15  ;;  %648 = vperm.xlu1 %1193, %v594_v13   ;;  %643 = vperm.xlu0 %1192, %v593_v15   ;;  %v611_v33 = vadd.f32 %v2375_v40, %v2374_v38 }
 0x26b   :  { %v1728_v8 = vadd.f32 %v608_v53, %v592_v27  ;;  %638 = vperm.xlu2 %1194, %v592_v27   ;;  %v2381_v27 = vld [vmem:[#allocation41_spill] sm:$0xff] }
 0x26d   :  { %2363 = vst [vmem:[#allocation27_spill] sm:$0xff] %v1728_v8  ;;  %v542_v4 = vpop.xlane.xlu1 %541  ;;  %v540_v35 = vpop.xlane.xlu2 %539 }
 0x26e   :  { %v1731_v18 = vmul.f32 %v542_v4, %v2364_v56  ;;  %v581_v28 = vsub.f32 1.0, %v542_v4  ;;  %v1734_v22 = vmul.f32 %v540_v35, %v2366_v1  ;;  %v580_v16 = vsub.f32 1.0, %v540_v35  ;;  %v538_v52 = vpop.xlane.xlu0 %537 }
 0x26f   :  { %v1737_v29 = vmul.f32 %v538_v52, %v2368_v62  ;;  %v579_v34 = vsub.f32 1.0, %v538_v52  ;;  %v2385_v52 = vld [vmem:[#allocation9_spill] sm:$0xff] }
 0x270   :  { %2365 = vst [vmem:[#allocation29_spill] sm:$0xff] %v1731_v18  ;;  %v597_v37 = vmul.f32 %v581_v28, %v2364_v56  ;;  %v596_v41 = vmul.f32 %v580_v16, %v2366_v1  ;;  %v2383_v28 = vld [vmem:[#allocation34_spill] sm:$0xff] }
 0x271   :  { %2367 = vst [vmem:[#allocation31_spill] sm:$0xff] %v1734_v22  ;;  %v595_v44 = vmul.f32 %v579_v34, %v2368_v62  ;;  %v2386_v62 = vld [vmem:[#allocation44_spill] sm:$0xff] }
 0x272   :  { %2369 = vst [vmem:[#allocation2_spill] sm:$0xff] %v1737_v29  ;;  %v1748_v48 = vadd.f32 %v613_v3, %v597_v37  ;;  %v1750_v17 = vadd.f32 %v612_v2, %v596_v41  ;;  %663 = vperm.xlu1 %1193, %v597_v37   ;;  %658 = vperm.xlu0 %1192, %v596_v41   ;;  %v2389_v3 = vld [vmem:[#allocation10_spill] sm:$0xff]  ;;  %v2390_v37 = vld [vmem:[#allocation43_spill] sm:$0xff] }
 0x273   :  { %v1752_v10 = vadd.f32 %v611_v33, %v595_v44  ;;  %653 = vperm.xlu2 %1194, %v595_v44   ;;  %v615_v34 = vadd.f32 %v2386_v62, %v2385_v52  ;;  %v616_v2 = vadd.f32 %v2388_v31, %v2387_v5  ;;  %v614_v41 = vadd.f32 %v2390_v37, %v2389_v3  ;;  %v2399_v62 = vld [vmem:[#allocation39_spill] sm:$0xff]  ;;  %v2401_v31 = vld [vmem:[#allocation49_spill] sm:$0xff] }
 0x274   :  { %2376 = vst [vmem:[#allocation33_spill] sm:$0xff] %v1748_v48  ;;  %v2404_v37 = vld [vmem:[#allocation51_spill] sm:$0xff] }
 0x275   :  { %2377 = vst [vmem:[#allocation3_spill] sm:$0xff] %v1750_v17  ;;  %v548_v13 = vpop.xlane.xlu1 %547  ;;  %v546_v15 = vpop.xlane.xlu2 %545  ;;  %v2423_v17 = vld [vmem:[#allocation28_spill] sm:$0xff] }
 0x276   :  { %2378 = vst [vmem:[#allocation36_spill] sm:$0xff] %v1752_v10  ;;  %v1755_v7 = vmul.f32 %v548_v13, %v2379_v14  ;;  %v584_v53 = vsub.f32 1.0, %v548_v13  ;;  %v1758_v4 = vmul.f32 %v546_v15, %v2381_v27  ;;  %v583_v35 = vsub.f32 1.0, %v546_v15  ;;  %v544_v56 = vpop.xlane.xlu0 %543  ;;  %v2394_v13 = vld [vmem:[#allocation12_spill] sm:$0xff] }
 0x277   :  { %v1761_v1 = vmul.f32 %v544_v56, %v2383_v28  ;;  %v582_v16 = vsub.f32 1.0, %v544_v56  ;;  %v2395_v15 = vsub.f32 1.0, %v2394_v13  ;;  %v2396_v56 = vld [vmem:[#allocation46_spill] sm:$0xff] }
 0x278   :  { %2380 = vst [vmem:[#allocation4_spill] sm:$0xff] %v1755_v7  ;;  %v600_v6 = vmul.f32 %v584_v53, %v2379_v14  ;;  %v599_v63 = vmul.f32 %v583_v35, %v2381_v27  ;;  %v2422_v7 = vld [vmem:[#allocation16_spill] sm:$0xff] }
 0x279   :  { %2382 = vst [vmem:[#allocation32_spill] sm:$0xff] %v1758_v4  ;;  %v598_v38 = vmul.f32 %v582_v16, %v2383_v28  ;;  %v324_v14 = vmul.f32 %v2396_v56, %v2395_v15  ;;  %v2405_v15 = vld [vmem:[#allocation13_spill] sm:$0xff]  ;;  %v2406_v56 = vld [vmem:[#allocation48_spill] sm:$0xff] }
 0x27a   :  { %2384 = vst [vmem:[#allocation40_spill] sm:$0xff] %v1761_v1  ;;  %v1772_v40 = vadd.f32 %v616_v2, %v600_v6  ;;  %v1774_v33 = vadd.f32 %v615_v34, %v599_v63  ;;  %678 = vperm.xlu1 %1193, %v600_v6   ;;  %673 = vperm.xlu0 %1192, %v599_v63   ;;  %v2402_v6 = vld [vmem:[#allocation11_spill] sm:$0xff]  ;;  %v2403_v63 = vld [vmem:[#allocation52_spill] sm:$0xff] }
 0x27b   :  { %v1776_v44 = vadd.f32 %v614_v41, %v598_v38  ;;  %668 = vperm.xlu2 %1194, %v598_v38   ;;  %v618_v2 = vadd.f32 %v2401_v31, %v2394_v13  ;;  %v619_v3 = vadd.f32 %v2403_v63, %v2402_v6  ;;  %v2411_v31 = vld [vmem:[#allocation14_spill] sm:$0xff]  ;;  %v2421_v1 = vld [vmem:[#allocation15_spill] sm:$0xff] }
 0x27c   :  { %2391 = vst [vmem:[#allocation35_spill] sm:$0xff] %v1772_v40  ;;  %v2412_v6 = vsub.f32 1.0, %v2411_v31 }
 0x27d   :  { %2392 = vst [vmem:[#allocation30_spill] sm:$0xff] %v1774_v33  ;;  %v1781_v53 = vpop.xlane.xlu1 %553  ;;  %v552_v27 = vpop.xlane.xlu2 %551  ;;  %v2420_v33 = vld [vmem:[#allocation25_spill] sm:$0xff] }
 0x27e   :  { %2393 = vst [vmem:[#allocation6_spill] sm:$0xff] %v1776_v44  ;;  %v587_v35 = vsub.f32 1.0, %v1781_v53  ;;  %v1784_v52 = vmul.f32 %v552_v27, %v324_v14  ;;  %v586_v28 = vsub.f32 1.0, %v552_v27  ;;  %v550_v16 = vpop.xlane.xlu0 %549 }
 0x27f   :  { %2397 = vst [vmem:[#allocation38_spill] sm:$0xff] %v1781_v53  ;;  %v1787_v34 = vmul.f32 %v550_v16, %v2399_v62  ;;  %v585_v5 = vsub.f32 1.0, %v550_v16  ;;  %v617_v53 = vadd.f32 %v2406_v56, %v2405_v15 }
 0x280   :  { %2398 = vst [vmem:[#allocation5_spill] sm:$0xff] %v1784_v52  ;;  %v603_v41 = vmul.f32 %v587_v35, %v2404_v37  ;;  %v602_v38 = vmul.f32 %v586_v28, %v324_v14  ;;  %v2413_v35 = vld [vmem:[#allocation50_spill] sm:$0xff] }
 0x281   :  { %2400 = vst [vmem:[#allocation42_spill] sm:$0xff] %v1787_v34  ;;  %v601_v52 = vmul.f32 %v585_v5, %v2399_v62  ;;  %v1808_v14 = vmul.f32 %v2413_v35, %v2412_v6  ;;  %v2415_v62 = vld [vmem:[#allocation53_spill] sm:$0xff] }
 0x282   :  { %v1797_v27 = vadd.f32 %v619_v3, %v603_v41  ;;  %v1799_v44 = vadd.f32 %v618_v2, %v602_v38  ;;  %693 = vperm.xlu1 %1193, %v603_v41   ;;  %688 = vperm.xlu0 %1192, %v602_v38   ;;  %v620_v5 = vadd.f32 %v2415_v62, %v2411_v31  ;;  %v2419_v34 = vld [vmem:[#allocation21_spill] sm:$0xff] }
 0x283   :  { %v1801_v16 = vadd.f32 %v617_v53, %v601_v52  ;;  %683 = vperm.xlu2 %1194, %v601_v52   ;;  %2414 = vst [vmem:[#allocation34_spill] sm:$0xff] %v1808_v14 }
 0x284   :  { %2407 = vst [vmem:[#allocation7_spill] sm:$0xff] %v1797_v27 }
 0x285   :  { %2408 = vst [vmem:[#allocation37_spill] sm:$0xff] %v1799_v44 }
 0x286   :  { %2409 = vst [vmem:[#allocation45_spill] sm:$0xff] %v1801_v16  ;;  %v1803_v13 = vpop.xlane.xlu0 %555 }
 0x287   :  { %2410 = vst [vmem:[#allocation41_spill] sm:$0xff] %v1803_v13  ;;  %v588_v28 = vsub.f32 1.0, %v1803_v13 }
 0x289   :  { %v604_v2 = vmul.f32 %v588_v28, %v1808_v14  ;;  %v2417_v28 = vld [vmem:[#allocation23_spill] sm:$0xff] }
 0x28b   :  { %v1814_v63 = vadd.f32 %v620_v5, %v604_v2  ;;  %698 = vperm.xlu2 %1194, %v604_v2  }
 0x28d   :  { %2416 = vst [vmem:[#allocation9_spill] sm:$0xff] %v1814_v63  ;;  %v2418_v63 = vld [vmem:[#allocation17_spill] sm:$0xff] }
 0x2bd   :  { %v624_v53 = vpop.permute.xlu2 %623 }
 0x2be   :  { %v701_v31 = vmul.f32 %v624_v53, %v1352_v32  ;;  %v2424_v32 = vld [vmem:[#allocation19_spill] sm:$0xff] }
 0x2c0   :  { %v717_v22 = vsub.f32 1.0, %v701_v31 }
 0x2c5   :  { %v639_v3 = vpop.permute.xlu2 %638 }
 0x2c6   :  { %v704_v5 = vmul.f32 %v639_v3, %v2417_v28  ;;  %v2425_v3 = vld [vmem:[#allocation24_spill] sm:$0xff] }
 0x2cd   :  { %v654_v52 = vpop.permute.xlu2 %653 }
 0x2ce   :  { %v707_v28 = vmul.f32 %v654_v52, %v2425_v3 }
 0x2d0   :  { %v723_v3 = vsub.f32 1.0, %v707_v28 }
 0x2d4   :  { %v629_v41 = vpop.permute.xlu1 %628  ;;  %v634_v38 = vpop.permute.xlu0 %633 }
 0x2d5   :  { %v669_v15 = vpop.permute.xlu2 %668  ;;  %v702_v2 = vmul.f32 %v629_v41, %v2353_v60  ;;  %v2426_v60 = vld [vmem:[#allocation22_spill] sm:$0xff] }
 0x2d6   :  { %v710_v40 = vmul.f32 %v669_v15, %v2420_v33  ;;  %v703_v41 = vmul.f32 %v634_v38, %v2426_v60 }
 0x2d8   :  { %v719_v38 = vsub.f32 1.0, %v703_v41 }
 0x2dc   :  { %v649_v56 = vpop.permute.xlu1 %648  ;;  %v644_v16 = vpop.permute.xlu0 %643 }
 0x2dd   :  { %v684_v6 = vpop.permute.xlu2 %683  ;;  %v705_v10 = vmul.f32 %v644_v16, %v2422_v7 }
 0x2de   :  { %v713_v4 = vmul.f32 %v684_v6, %v2421_v1  ;;  %v726_v1 = vsub.f32 1.0, %v710_v40 }
 0x2df   :  { %v721_v7 = vsub.f32 1.0, %v705_v10 }
 0x2e0   :  { %v729_v6 = vsub.f32 1.0, %v713_v4 }
 0x2e2   :  { %v737_v40 = vmul.f32 %v729_v6, %v721_v7 }
 0x2e4   :  { %v664_v35 = vpop.permute.xlu1 %663  ;;  %v659_v44 = vpop.permute.xlu0 %658 }
 0x2e5   :  { %v699_v62 = vpop.permute.xlu2 %698  ;;  %v709_v14 = vmul.f32 %v664_v35, %v2418_v63  ;;  %v708_v48 = vmul.f32 %v659_v44, %v2423_v17  ;;  %v2427_v63 = vld [vmem:[#allocation18_spill] sm:$0xff] }
 0x2e6   :  { %v716_v29 = vmul.f32 %v699_v62, %v1426_v0  ;;  %v706_v35 = vmul.f32 %v649_v56, %v2427_v63 }
 0x2e7   :  { %v725_v33 = vsub.f32 1.0, %v709_v14  ;;  %v724_v16 = vsub.f32 1.0, %v708_v48 }
 0x2e8   :  { %v732_v0 = vsub.f32 1.0, %v716_v29  ;;  %v722_v60 = vsub.f32 1.0, %v706_v35 }
 0x2e9   :  { %v733_v56 = vmul.f32 %v725_v33, %v717_v22 }
 0x2ea   :  { %v740_v4 = vmul.f32 %v732_v0, %v724_v16 }
 0x2eb   :  { %v741_v18 = vmul.f32 %v737_v40, %v733_v56 }
 0x2ec   :  { %v679_v13 = vpop.permute.xlu1 %678  ;;  %v674_v27 = vpop.permute.xlu0 %673 }
 0x2ed   :  { %v712_v37 = vmul.f32 %v679_v13, %v2419_v34  ;;  %v711_v53 = vmul.f32 %v674_v27, %v2424_v32  ;;  %v720_v34 = vsub.f32 1.0, %v704_v5  ;;  %v718_v13 = vsub.f32 1.0, %v702_v2  ;;  %v2428_v27 = vld [vmem:[#allocation26_spill] sm:$0xff]  ;;  %v2429_v32 = vld [vmem:[#allocation20_spill] sm:$0xff] }
 0x2ef   :  { %v728_v15 = vsub.f32 1.0, %v712_v37  ;;  %v727_v62 = vsub.f32 1.0, %v711_v53  ;;  %v734_v37 = vmul.f32 %v726_v1, %v718_v13 }
 0x2f1   :  { %v736_v5 = vmul.f32 %v728_v15, %v720_v34  ;;  %v735_v10 = vmul.f32 %v727_v62, %v719_v38 }
 0x2f3   :  { %v744_v29 = vmul.f32 %v740_v4, %v736_v5 }
 0x2f4   :  { %v694_v17 = vpop.permute.xlu1 %693  ;;  %v689_v44 = vpop.permute.xlu0 %688 }
 0x2f5   :  { %v715_v31 = vmul.f32 %v694_v17, %v2428_v27  ;;  %v714_v52 = vmul.f32 %v689_v44, %v2429_v32 }
 0x2f7   :  { %v731_v2 = vsub.f32 1.0, %v715_v31  ;;  %v730_v14 = vsub.f32 1.0, %v714_v52 }
 0x2f9   :  { %v739_v48 = vmul.f32 %v731_v2, %v723_v3  ;;  %v738_v63 = vmul.f32 %v730_v14, %v722_v60 }
 0x2fb   :  { %v743_v53 = vmul.f32 %v739_v48, %v735_v10  ;;  %v742_v8 = vmul.f32 %v738_v63, %v734_v37 }
 0x2fd   :  { %v745_v17 = vmul.f32 %v743_v53, %v741_v18  ;;  %v746_v27 = vmul.f32 %v744_v29, %v742_v8 }
 0x2ff   :  { %v747_v44 = vmul.f32 %v746_v27, %v745_v17 }
 0x301   :  { %v748_v28 = vrot.slane %v747_v44, 4 }
 0x303   :  { %v749_v41 = vmul.f32 %v748_v28, %v747_v44 }
 0x305   :  { %v750_v35 = vrot.slane %v749_v41, 6 }
 0x307   :  { %v751_v22 = vmul.f32 %v750_v35, %v749_v41 }
 0x309   :  { %v752_v34 = vrot.slane %v751_v22, 7 }
 0x30b   :  { %v753_v33 = vmul.f32 %v752_v34, %v751_v22 }
 0x30d   :  { %v754_v15 = vperm.slane %v753_v33, 0 }
 0x30f   :  { %v757_v13 = vmul.f32 %v1441_v21, %v754_v15  ;;  %v756_v1 = vmul.f32 %v1444_v23, %v754_v15  ;;  %v755_v6 = vmul.f32 %v1447_v25, %v754_v15  ;;  %v760_v18 = vmul.f32 %v1488_v57, %v754_v15 }
 0x310   :  { %v759_v8 = vmul.f32 %v1470_v46, %v754_v15  ;;  %v758_v7 = vmul.f32 %v1467_v47, %v754_v15  ;;  %v763_v16 = vmul.f32 %v1509_v20, %v754_v15  ;;  %v762_v0 = vmul.f32 %v1491_v58, %v754_v15 }
 0x311   :  { %775 = vadd.xlane.f32.xlu2 %v757_v13  ;;  %773 = vadd.xlane.f32.xlu1 %v756_v1  ;;  %v761_v62 = vmul.f32 %v1464_v43, %v754_v15  ;;  %v766_v31 = vmul.f32 %v1530_v24, %v754_v15  ;;  %v765_v32 = vmul.f32 %v1512_v45, %v754_v15 }
 0x312   :  { %771 = vadd.xlane.f32.xlu0 %v755_v6  ;;  %v764_v52 = vmul.f32 %v1485_v55, %v754_v15  ;;  %v769_v3 = vmul.f32 %v1544_v59, %v754_v15  ;;  %v768_v38 = vmul.f32 %v1533_v50, %v754_v15  ;;  %v767_v60 = vmul.f32 %v1506_v19, %v754_v15  ;;  %v2430_v6 = vld [vmem:[#allocation27_spill] sm:$0xff] }
 0x313   :  { %v770_v56 = vmul.f32 %v1527_v42, %v754_v15 }
 0x319   :  { %781 = vadd.xlane.f32.xlu2 %v760_v18  ;;  %779 = vadd.xlane.f32.xlu1 %v759_v8  ;;  %v2432_v8 = vld [vmem:[#allocation31_spill] sm:$0xff] }
 0x31a   :  { %777 = vadd.xlane.f32.xlu0 %v758_v7 }
 0x321   :  { %787 = vadd.xlane.f32.xlu2 %v763_v16  ;;  %785 = vadd.xlane.f32.xlu1 %v762_v0 }
 0x322   :  { %783 = vadd.xlane.f32.xlu0 %v761_v62  ;;  %v2433_v62 = vld [vmem:[#allocation2_spill] sm:$0xff] }
 0x329   :  { %793 = vadd.xlane.f32.xlu2 %v766_v31  ;;  %791 = vadd.xlane.f32.xlu1 %v765_v32 }
 0x32a   :  { %789 = vadd.xlane.f32.xlu0 %v764_v52 }
 0x331   :  { %799 = vadd.xlane.f32.xlu2 %v769_v3  ;;  %797 = vadd.xlane.f32.xlu1 %v768_v38 }
 0x332   :  { %795 = vadd.xlane.f32.xlu0 %v767_v60  ;;  %v2434_v60 = vld [vmem:[#allocation33_spill] sm:$0xff] }
 0x33a   :  { %801 = vadd.xlane.f32.xlu0 %v770_v56 }
 0x384   :  { %v776_v5 = vpop.xlane.xlu2 %775  ;;  %v774_v2 = vpop.xlane.xlu1 %773 }
 0x385   :  { %v1849_v14 = vmul.f32 %v776_v5, %v1683_v11  ;;  %v821_v37 = vsub.f32 1.0, %v776_v5  ;;  %v1852_v40 = vmul.f32 %v774_v2, %v1686_v61  ;;  %v820_v4 = vsub.f32 1.0, %v774_v2  ;;  %v772_v10 = vpop.xlane.xlu0 %771  ;;  %v2435_v5 = vld [vmem:[#allocation3_spill] sm:$0xff] }
 0x386   :  { %v1855_v48 = vmul.f32 %v772_v10, %v1689_v12  ;;  %v819_v63 = vsub.f32 1.0, %v772_v10 }
 0x387   :  { %v837_v29 = vmul.f32 %v821_v37, %v1683_v11  ;;  %v836_v53 = vmul.f32 %v820_v4, %v1686_v61  ;;  %v2436_v37 = vld [vmem:[#allocation36_spill] sm:$0xff] }
 0x388   :  { %v835_v17 = vmul.f32 %v819_v63, %v1689_v12 }
 0x389   :  { %v1099_v27 = vadd.f32 %v1700_v30, %v837_v29  ;;  %v1098_v44 = vadd.f32 %v1702_v36, %v836_v53  ;;  %874 = vperm.xlu2 %1194, %v836_v53   ;;  %879 = vperm.xlu0 %1192, %v837_v29   ;;  %v2437_v29 = vld [vmem:[#allocation4_spill] sm:$0xff] }
 0x38a   :  { %v1097_v28 = vadd.f32 %v1704_v54, %v835_v17  ;;  %869 = vperm.xlu1 %1193, %v835_v17  }
 0x38b   :  { %1148 = vst.msk [vmem:[%s2222_s4 + $0x10] sm:$0xff] %vm1113_vm0, %v1099_v27  ;;  %v2438_v27 = vld [vmem:[#allocation32_spill] sm:$0xff] }
 0x38c   :  { %1147 = vst.msk [vmem:[%s2222_s4 + $0x8] sm:$0xff] %vm1113_vm0, %v1098_v44  ;;  %v782_v11 = vpop.xlane.xlu2 %781  ;;  %v780_v61 = vpop.xlane.xlu1 %779 }
 0x38d   :  { %1146 = vst.msk [vmem:[%s2222_s4] sm:$0xff] %vm1113_vm0, %v1097_v28  ;;  %v1876_v12 = vmul.f32 %v782_v11, %v1707_v49  ;;  %v824_v30 = vsub.f32 1.0, %v782_v11  ;;  %v1879_v36 = vmul.f32 %v780_v61, %v1710_v26  ;;  %v823_v54 = vsub.f32 1.0, %v780_v61  ;;  %v778_v41 = vpop.xlane.xlu0 %777  ;;  %v2439_v61 = vld [vmem:[#allocation40_spill] sm:$0xff] }
 0x38e   :  { %v1882_v35 = vmul.f32 %v778_v41, %v1713_v39  ;;  %v822_v22 = vsub.f32 1.0, %v778_v41 }
 0x38f   :  { %v840_v34 = vmul.f32 %v824_v30, %v1707_v49  ;;  %v839_v33 = vmul.f32 %v823_v54, %v1710_v26 }
 0x390   :  { %v838_v15 = vmul.f32 %v822_v22, %v1713_v39  ;;  %v2431_v39 = vld [vmem:[#allocation29_spill] sm:$0xff] }
 0x391   :  { %v1102_v13 = vadd.f32 %v1724_v51, %v840_v34  ;;  %v1101_v1 = vadd.f32 %v1726_v9, %v839_v33  ;;  %894 = vperm.xlu2 %1194, %v840_v34   ;;  %889 = vperm.xlu0 %1192, %v839_v33   ;;  %v2440_v33 = vld [vmem:[#allocation35_spill] sm:$0xff] }
 0x392   :  { %v1100_v18 = vadd.f32 %v2430_v6, %v838_v15  ;;  %884 = vperm.xlu1 %1193, %v838_v15   ;;  %v2442_v6 = vld [vmem:[#allocation6_spill] sm:$0xff] }
 0x393   :  { %1151 = vst.msk [vmem:[%s2222_s4 + $0x28] sm:$0xff] %vm1113_vm0, %v1102_v13  ;;  %v2441_v13 = vld [vmem:[#allocation30_spill] sm:$0xff] }
 0x394   :  { %1150 = vst.msk [vmem:[%s2222_s4 + $0x20] sm:$0xff] %vm1113_vm0, %v1101_v1  ;;  %v788_v49 = vpop.xlane.xlu2 %787  ;;  %v786_v26 = vpop.xlane.xlu1 %785 }
 0x395   :  { %1149 = vst.msk [vmem:[%s2222_s4 + $0x18] sm:$0xff] %vm1113_vm0, %v1100_v18  ;;  %v1903_v51 = vmul.f32 %v788_v49, %v2431_v39  ;;  %v827_v9 = vsub.f32 1.0, %v788_v49  ;;  %v1906_v7 = vmul.f32 %v786_v26, %v2432_v8  ;;  %v826_v16 = vsub.f32 1.0, %v786_v26  ;;  %v784_v0 = vpop.xlane.xlu0 %783  ;;  %v2443_v49 = vld [vmem:[#allocation51_spill] sm:$0xff]  ;;  %v2444_v26 = vld [vmem:[#allocation38_spill] sm:$0xff] }
 0x396   :  { %v1909_v31 = vmul.f32 %v784_v0, %v2433_v62  ;;  %v825_v32 = vsub.f32 1.0, %v784_v0 }
 0x397   :  { %v843_v52 = vmul.f32 %v827_v9, %v2431_v39  ;;  %v842_v3 = vmul.f32 %v826_v16, %v2432_v8  ;;  %v571_v39 = vmul.f32 %v2444_v26, %v2443_v49 }
 0x398   :  { %v841_v38 = vmul.f32 %v825_v32, %v2433_v62 }
 0x399   :  { %v1105_v56 = vadd.f32 %v2434_v60, %v843_v52  ;;  %v1104_v2 = vadd.f32 %v2435_v5, %v842_v3  ;;  %909 = vperm.xlu2 %1194, %v843_v52   ;;  %904 = vperm.xlu0 %1192, %v842_v3   ;;  %v2447_v52 = vld [vmem:[#allocation42_spill] sm:$0xff] }
 0x39a   :  { %v1103_v4 = vadd.f32 %v2436_v37, %v841_v38  ;;  %899 = vperm.xlu1 %1193, %v841_v38   ;;  %v2450_v37 = vld [vmem:[#allocation7_spill] sm:$0xff] }
 0x39b   :  { %1154 = vst.msk [vmem:[%s2222_s4 + $0x40] sm:$0xff] %vm1113_vm0, %v1105_v56  ;;  %v2449_v56 = vld [vmem:[#allocation5_spill] sm:$0xff] }
 0x39c   :  { %1153 = vst.msk [vmem:[%s2222_s4 + $0x38] sm:$0xff] %vm1113_vm0, %v1104_v2  ;;  %v794_v10 = vpop.xlane.xlu2 %793  ;;  %v792_v63 = vpop.xlane.xlu1 %791 }
 0x39d   :  { %1152 = vst.msk [vmem:[%s2222_s4 + $0x30] sm:$0xff] %vm1113_vm0, %v1103_v4  ;;  %v1930_v53 = vmul.f32 %v794_v10, %v2437_v29  ;;  %v830_v17 = vsub.f32 1.0, %v794_v10  ;;  %v1933_v44 = vmul.f32 %v792_v63, %v2438_v27  ;;  %v829_v28 = vsub.f32 1.0, %v792_v63  ;;  %v790_v11 = vpop.xlane.xlu0 %789  ;;  %v2451_v10 = vld [vmem:[#allocation37_spill] sm:$0xff] }
 0x39e   :  { %v1936_v30 = vmul.f32 %v790_v11, %v2439_v61  ;;  %v828_v54 = vsub.f32 1.0, %v790_v11  ;;  %v2455_v11 = vld [vmem:[#allocation41_spill] sm:$0xff] }
 0x39f   :  { %v846_v41 = vmul.f32 %v830_v17, %v2437_v29  ;;  %v845_v22 = vmul.f32 %v829_v28, %v2438_v27  ;;  %v2452_v29 = vld [vmem:[#allocation45_spill] sm:$0xff]  ;;  %v2454_v28 = vld [vmem:[#allocation34_spill] sm:$0xff] }
 0x3a0   :  { %v844_v34 = vmul.f32 %v828_v54, %v2439_v61  ;;  %v1987_v61 = vmul.f32 %v2455_v11, %v2454_v28  ;;  %v1200_v11 = vld [vmem:[%s2221_s0 + $0x28] sm:$0xff] }
 0x3a1   :  { %v1108_v15 = vadd.f32 %v2440_v33, %v846_v41  ;;  %v1107_v1 = vadd.f32 %v2441_v13, %v845_v22  ;;  %924 = vperm.xlu2 %1194, %v846_v41   ;;  %919 = vperm.xlu0 %1192, %v845_v22   ;;  %v2457_v22 = vld [vmem:[#allocation9_spill] sm:$0xff] }
 0x3a2   :  { %v1106_v18 = vadd.f32 %v2442_v6, %v844_v34  ;;  %914 = vperm.xlu1 %1193, %v844_v34   ;;  %2456 = vst [vmem:[#allocation43_spill] sm:$0xff] %v1987_v61 }
 0x3a3   :  { %1157 = vst.msk [vmem:[%s2222_s4 + $0x58] sm:$0xff] %vm1113_vm0, %v1108_v15 }
 0x3a4   :  { %1156 = vst.msk [vmem:[%s2222_s4 + $0x50] sm:$0xff] %vm1113_vm0, %v1107_v1  ;;  %v800_v9 = vpop.xlane.xlu2 %799  ;;  %v1954_v8 = vpop.xlane.xlu1 %797 }
 0x3a5   :  { %2445 = vst [vmem:[#allocation44_spill] sm:$0xff] %v1954_v8  ;;  %v1960_v16 = vmul.f32 %v800_v9, %v571_v39  ;;  %v833_v0 = vsub.f32 1.0, %v800_v9  ;;  %v832_v62 = vsub.f32 1.0, %v1954_v8  ;;  %v796_v32 = vpop.xlane.xlu0 %795 }
 0x3a6   :  { %1155 = vst.msk [vmem:[%s2222_s4 + $0x48] sm:$0xff] %vm1113_vm0, %v1106_v18  ;;  %v1964_v3 = vmul.f32 %v796_v32, %v2447_v52  ;;  %v831_v38 = vsub.f32 1.0, %v796_v32 }
 0x3a7   :  { %2446 = vst [vmem:[#allocation8_spill] sm:$0xff] %v1960_v16  ;;  %v849_v60 = vmul.f32 %v833_v0, %v571_v39  ;;  %v848_v5 = vmul.f32 %v832_v62, %v2449_v56 }
 0x3a8   :  { %2448 = vst [vmem:[#allocation47_spill] sm:$0xff] %v1964_v3  ;;  %v847_v2 = vmul.f32 %v831_v38, %v2447_v52  ;;  %v1195_v38 = vld [vmem:[%s2221_s0 + $0x60] sm:$0xff] }
 0x3a9   :  { %v1111_v4 = vadd.f32 %v2450_v37, %v849_v60  ;;  %v1110_v63 = vadd.f32 %v2451_v10, %v848_v5  ;;  %939 = vperm.xlu2 %1194, %v849_v60   ;;  %934 = vperm.xlu0 %1192, %v848_v5   ;;  %v1196_v5 = vld [vmem:[%s2221_s0] sm:$0xff] }
 0x3aa   :  { %v1109_v17 = vadd.f32 %v2452_v29, %v847_v2  ;;  %929 = vperm.xlu1 %1193, %v847_v2  }
 0x3ab   :  { %1160 = vst.msk [vmem:[%s2222_s4 + $0x70] sm:$0xff] %vm1113_vm0, %v1111_v4  ;;  %v1197_v4 = vld [vmem:[%s2221_s0 + $0x20] sm:$0xff] }
 0x3ac   :  { %1159 = vst.msk [vmem:[%s2222_s4 + $0x68] sm:$0xff] %vm1113_vm0, %v1110_v63  ;;  %v1198_v63 = vld [vmem:[%s2221_s0 + $0x50] sm:$0xff] }
 0x3ad   :  { %1158 = vst.msk [vmem:[%s2222_s4 + $0x60] sm:$0xff] %vm1113_vm0, %v1109_v17  ;;  %v1983_v27 = vpop.xlane.xlu0 %801  ;;  %v1199_v17 = vld [vmem:[%s2221_s0 + $0x68] sm:$0xff] }
 0x3ae   :  { %2453 = vst [vmem:[#allocation10_spill] sm:$0xff] %v1983_v27  ;;  %v834_v54 = vsub.f32 1.0, %v1983_v27 }
 0x3b0   :  { %v850_v41 = vmul.f32 %v834_v54, %v1987_v61 }
 0x3b2   :  { %v1112_v34 = vadd.f32 %v2457_v22, %v850_v41  ;;  %944 = vperm.xlu1 %1193, %v850_v41   ;;  %v1201_v41 = vld [vmem:[%s2221_s0 + $0x40] sm:$0xff] }
 0x3b4   :  { %1161 = vst.msk [vmem:[%s2222_s4 + $0x78] sm:$0xff] %vm1113_vm0, %v1112_v34  ;;  %v1202_v34 = vld [vmem:[%s2221_s0 + $0x10] sm:$0xff] }
 0x3e3   :  { %v875_v33 = vpop.permute.xlu2 %874 }
 0x3eb   :  { %v895_v1 = vpop.permute.xlu2 %894 }
 0x3ec   :  { %v952_v54 = vmul.f32 %v1200_v11, %v895_v1 }
 0x3f3   :  { %v910_v49 = vpop.permute.xlu2 %909 }
 0x3f4   :  { %v955_v22 = vmul.f32 %v1201_v41, %v910_v49 }
 0x3fb   :  { %v880_v15 = vpop.permute.xlu0 %879  ;;  %v925_v62 = vpop.permute.xlu2 %924 }
 0x3fc   :  { %v870_v13 = vpop.permute.xlu1 %869 }
 0x3fd   :  { %v947_v2 = vmul.f32 %v1196_v5, %v870_v13  ;;  %v949_v13 = vmul.f32 %v1202_v34, %v880_v15  ;;  %v1206_v15 = vld [vmem:[%s2221_s0 + $0x8] sm:$0xff] }
 0x3fe   :  { %v948_v5 = vmul.f32 %v1206_v15, %v875_v33  ;;  %v968_v33 = vsub.f32 1.0, %v952_v54 }
 0x403   :  { %v890_v6 = vpop.permute.xlu0 %889  ;;  %v940_v37 = vpop.permute.xlu2 %939 }
 0x404   :  { %v885_v18 = vpop.permute.xlu1 %884  ;;  %v951_v10 = vmul.f32 %v1197_v4, %v890_v6  ;;  %v1203_v6 = vld [vmem:[%s2221_s0 + $0x18] sm:$0xff] }
 0x406   :  { %v967_v11 = vsub.f32 1.0, %v951_v10 }
 0x40b   :  { %v905_v26 = vpop.permute.xlu0 %904 }
 0x40c   :  { %v900_v39 = vpop.permute.xlu1 %899 }
 0x413   :  { %v920_v9 = vpop.permute.xlu0 %919 }
 0x414   :  { %v915_v0 = vpop.permute.xlu1 %914  ;;  %v957_v29 = vmul.f32 %v1198_v63, %v920_v9  ;;  %v950_v9 = vmul.f32 %v1203_v6, %v885_v18  ;;  %v1207_v18 = vld [vmem:[%s2221_s0 + $0x58] sm:$0xff]  ;;  %v963_v63 = vsub.f32 1.0, %v947_v2  ;;  %v971_v6 = vsub.f32 1.0, %v955_v22 }
 0x415   :  { %v958_v4 = vmul.f32 %v1207_v18, %v925_v62 }
 0x416   :  { %v973_v41 = vsub.f32 1.0, %v957_v29  ;;  %v979_v61 = vmul.f32 %v971_v6, %v963_v63 }
 0x417   :  { %v974_v27 = vsub.f32 1.0, %v958_v4 }
 0x41b   :  { %v935_v52 = vpop.permute.xlu0 %934 }
 0x41c   :  { %v930_v32 = vpop.permute.xlu1 %929  ;;  %v960_v28 = vmul.f32 %v1199_v17, %v935_v52  ;;  %v1205_v52 = vld [vmem:[%s2221_s0 + $0x48] sm:$0xff] }
 0x41d   :  { %v959_v60 = vmul.f32 %v1195_v38, %v930_v32  ;;  %v1204_v32 = vld [vmem:[%s2221_s0 + $0x30] sm:$0xff]  ;;  %v956_v49 = vmul.f32 %v1205_v52, %v915_v0  ;;  %v1209_v0 = vld [vmem:[%s2221_s0 + $0x38] sm:$0xff]  ;;  %v966_v52 = vsub.f32 1.0, %v950_v9 }
 0x41e   :  { %v953_v1 = vmul.f32 %v1204_v32, %v900_v39  ;;  %v1208_v39 = vld [vmem:[%s2221_s0 + $0x70] sm:$0xff]  ;;  %v976_v34 = vsub.f32 1.0, %v960_v28  ;;  %v965_v32 = vsub.f32 1.0, %v949_v13 }
 0x41f   :  { %v975_v38 = vsub.f32 1.0, %v959_v60  ;;  %v961_v17 = vmul.f32 %v1208_v39, %v940_v37  ;;  %v954_v60 = vmul.f32 %v1209_v0, %v905_v26  ;;  %v972_v2 = vsub.f32 1.0, %v956_v49  ;;  %v1210_v37 = vld [vmem:[%s2221_s0 + $0x78] sm:$0xff] }
 0x420   :  { %v969_v62 = vsub.f32 1.0, %v953_v1  ;;  %v964_v39 = vsub.f32 1.0, %v948_v5  ;;  %v981_v29 = vmul.f32 %v973_v41, %v965_v32  ;;  %v984_v28 = vmul.f32 %v976_v34, %v968_v33 }
 0x421   :  { %v983_v18 = vmul.f32 %v975_v38, %v967_v11  ;;  %v977_v3 = vsub.f32 1.0, %v961_v17  ;;  %v970_v26 = vsub.f32 1.0, %v954_v60  ;;  %v982_v22 = vmul.f32 %v974_v27, %v966_v52 }
 0x422   :  { %v980_v9 = vmul.f32 %v972_v2, %v964_v39 }
 0x423   :  { %v985_v13 = vmul.f32 %v977_v3, %v969_v62  ;;  %v987_v0 = vmul.f32 %v983_v18, %v979_v61 }
 0x424   :  { %v945_v15 = vpop.permute.xlu1 %944  ;;  %v988_v38 = vmul.f32 %v984_v28, %v980_v9 }
 0x425   :  { %v962_v10 = vmul.f32 %v1210_v37, %v945_v15  ;;  %v989_v49 = vmul.f32 %v985_v13, %v981_v29 }
 0x427   :  { %v978_v54 = vsub.f32 1.0, %v962_v10  ;;  %v991_v16 = vmul.f32 %v989_v49, %v987_v0 }
 0x429   :  { %v986_v1 = vmul.f32 %v978_v54, %v970_v26 }
 0x42b   :  { %v990_v11 = vmul.f32 %v986_v1, %v982_v22 }
 0x42d   :  { %v992_v8 = vmul.f32 %v990_v11, %v988_v38 }
 0x42f   :  { %v993_v56 = vmul.f32 %v992_v8, %v991_v16 }
 0x431   :  { %v994_v15 = vrot.slane %v993_v56, 4 }
 0x433   :  { %v995_v5 = vmul.f32 %v994_v15, %v993_v56 }
 0x435   :  { %v996_v4 = vrot.slane %v995_v5, 6 }
 0x437   :  { %v997_v63 = vmul.f32 %v996_v4, %v995_v5 }
 0x439   :  { %v998_v17 = vrot.slane %v997_v63, 7 }
 0x43b   :  { %v999_v60 = vmul.f32 %v998_v17, %v997_v63 }
 0x43d   :  { %v1000_v41 = vperm.slane %v999_v60, 0 }
 0x43f   :  { %v1003_v34 = vmul.f32 %v1441_v21, %v1000_v41  ;;  %v1002_v3 = vmul.f32 %v1444_v23, %v1000_v41  ;;  %v1001_v27 = vmul.f32 %v1447_v25, %v1000_v41  ;;  %v1006_v61 = vmul.f32 %v1488_v57, %v1000_v41 }
 0x440   :  { %v1005_v8 = vmul.f32 %v1470_v46, %v1000_v41  ;;  %v1004_v16 = vmul.f32 %v1467_v47, %v1000_v41  ;;  %v1009_v56 = vmul.f32 %v1509_v20, %v1000_v41  ;;  %v1008_v21 = vmul.f32 %v1491_v58, %v1000_v41 }
 0x441   :  { %1021 = vadd.xlane.f32.xlu1 %v1003_v34  ;;  %1019 = vadd.xlane.f32.xlu2 %v1002_v3  ;;  %v1007_v23 = vmul.f32 %v1464_v43, %v1000_v41  ;;  %v1012_v25 = vmul.f32 %v1530_v24, %v1000_v41  ;;  %v1011_v57 = vmul.f32 %v1512_v45, %v1000_v41 }
 0x442   :  { %1017 = vadd.xlane.f32.xlu0 %v1001_v27  ;;  %v1010_v46 = vmul.f32 %v1485_v55, %v1000_v41  ;;  %v1015_v47 = vmul.f32 %v1544_v59, %v1000_v41  ;;  %v1014_v20 = vmul.f32 %v1533_v50, %v1000_v41  ;;  %v1013_v58 = vmul.f32 %v1506_v19, %v1000_v41 }
 0x443   :  { %v1016_v43 = vmul.f32 %v1527_v42, %v1000_v41 }
 0x449   :  { %1027 = vadd.xlane.f32.xlu1 %v1006_v61  ;;  %1025 = vadd.xlane.f32.xlu2 %v1005_v8 }
 0x44a   :  { %1023 = vadd.xlane.f32.xlu0 %v1004_v16  ;;  %v2460_v16 = vld [vmem:[#allocation8_spill] sm:$0xff] }
 0x451   :  { %1033 = vadd.xlane.f32.xlu1 %v1009_v56  ;;  %1031 = vadd.xlane.f32.xlu2 %v1008_v21 }
 0x452   :  { %1029 = vadd.xlane.f32.xlu0 %v1007_v23 }
 0x459   :  { %1039 = vadd.xlane.f32.xlu1 %v1012_v25  ;;  %1037 = vadd.xlane.f32.xlu2 %v1011_v57 }
 0x45a   :  { %1035 = vadd.xlane.f32.xlu0 %v1010_v46 }
 0x461   :  { %1045 = vadd.xlane.f32.xlu1 %v1015_v47  ;;  %1043 = vadd.xlane.f32.xlu2 %v1014_v20 }
 0x462   :  { %1041 = vadd.xlane.f32.xlu0 %v1013_v58  ;;  %v2461_v58 = vld [vmem:[#allocation47_spill] sm:$0xff] }
 0x46a   :  { %1047 = vadd.xlane.f32.xlu0 %v1016_v43 }
 0x4b4   :  { %v1022_v24 = vpop.xlane.xlu1 %1021  ;;  %v1020_v33 = vpop.xlane.xlu2 %1019 }
 0x4b5   :  { %v1051_v45 = vmul.f32 %v1022_v24, %v1849_v14  ;;  %v1067_v55 = vsub.f32 1.0, %v1022_v24  ;;  %v1050_v6 = vmul.f32 %v1020_v33, %v1852_v40  ;;  %v1066_v32 = vsub.f32 1.0, %v1020_v33  ;;  %v1018_v52 = vpop.xlane.xlu0 %1017  ;;  %v2462_v33 = vld [vmem:[#allocation43_spill] sm:$0xff] }
 0x4b6   :  { %v1065_v59 = vsub.f32 1.0, %v1018_v52  ;;  %v1049_v42 = vmul.f32 %v1018_v52, %v1855_v48 }
 0x4b7   :  { %v1083_v50 = vmul.f32 %v1067_v55, %v1849_v14  ;;  %1116 = vst.msk [vmem:[%s2223_s2 + $0x10] sm:$0xff] %vm1113_vm0, %v1051_v45  ;;  %v1082_v19 = vmul.f32 %v1066_v32, %v1852_v40  ;;  %v2463_v45 = vld [vmem:[#allocation10_spill] sm:$0xff] }
 0x4b8   :  { %1115 = vst.msk [vmem:[%s2223_s2 + $0x8] sm:$0xff] %vm1113_vm0, %v1050_v6  ;;  %v1081_v62 = vmul.f32 %v1065_v59, %v1855_v48  ;;  %v818_v55 = vmul.f32 %v2463_v45, %v2462_v33 }
 0x4b9   :  { %1132 = vst.msk [vmem:[%s2224_s3 + $0x10] sm:$0xff] %vm1113_vm0, %v1083_v50 }
 0x4ba   :  { %1131 = vst.msk [vmem:[%s2224_s3 + $0x8] sm:$0xff] %vm1113_vm0, %v1082_v19 }
 0x4bb   :  { %1114 = vst.msk [vmem:[%s2223_s2] sm:$0xff] %vm1113_vm0, %v1049_v42 }
 0x4bc   :  { %1130 = vst.msk [vmem:[%s2224_s3] sm:$0xff] %vm1113_vm0, %v1081_v62  ;;  %v1028_v14 = vpop.xlane.xlu1 %1027  ;;  %v1026_v40 = vpop.xlane.xlu2 %1025 }
 0x4bd   :  { %v1054_v48 = vmul.f32 %v1028_v14, %v1876_v12  ;;  %v1070_v2 = vsub.f32 1.0, %v1028_v14  ;;  %v1053_v18 = vmul.f32 %v1026_v40, %v1879_v36  ;;  %v1069_v37 = vsub.f32 1.0, %v1026_v40  ;;  %v1024_v10 = vpop.xlane.xlu0 %1023 }
 0x4be   :  { %v1068_v39 = vsub.f32 1.0, %v1024_v10  ;;  %v1052_v28 = vmul.f32 %v1024_v10, %v1882_v35 }
 0x4bf   :  { %v1086_v26 = vmul.f32 %v1070_v2, %v1876_v12  ;;  %1119 = vst.msk [vmem:[%s2223_s2 + $0x28] sm:$0xff] %vm1113_vm0, %v1054_v48  ;;  %v1085_v29 = vmul.f32 %v1069_v37, %v1879_v36 }
 0x4c0   :  { %1118 = vst.msk [vmem:[%s2223_s2 + $0x20] sm:$0xff] %vm1113_vm0, %v1053_v18  ;;  %v1084_v54 = vmul.f32 %v1068_v39, %v1882_v35 }
 0x4c1   :  { %1135 = vst.msk [vmem:[%s2224_s3 + $0x28] sm:$0xff] %vm1113_vm0, %v1086_v26 }
 0x4c2   :  { %1134 = vst.msk [vmem:[%s2224_s3 + $0x20] sm:$0xff] %vm1113_vm0, %v1085_v29 }
 0x4c3   :  { %1117 = vst.msk [vmem:[%s2223_s2 + $0x18] sm:$0xff] %vm1113_vm0, %v1052_v28 }
 0x4c4   :  { %1133 = vst.msk [vmem:[%s2224_s3 + $0x18] sm:$0xff] %vm1113_vm0, %v1084_v54  ;;  %v1034_v12 = vpop.xlane.xlu1 %1033  ;;  %v1032_v36 = vpop.xlane.xlu2 %1031 }
 0x4c5   :  { %v1057_v35 = vmul.f32 %v1034_v12, %v1903_v51  ;;  %v1073_v22 = vsub.f32 1.0, %v1034_v12  ;;  %v1056_v13 = vmul.f32 %v1032_v36, %v1906_v7  ;;  %v1072_v9 = vsub.f32 1.0, %v1032_v36  ;;  %v1030_v0 = vpop.xlane.xlu0 %1029 }
 0x4c6   :  { %v1071_v1 = vsub.f32 1.0, %v1030_v0  ;;  %v1055_v11 = vmul.f32 %v1030_v0, %v1909_v31 }
 0x4c7   :  { %v1089_v49 = vmul.f32 %v1073_v22, %v1903_v51  ;;  %1122 = vst.msk [vmem:[%s2223_s2 + $0x40] sm:$0xff] %vm1113_vm0, %v1057_v35  ;;  %v1088_v38 = vmul.f32 %v1072_v9, %v1906_v7 }
 0x4c8   :  { %1121 = vst.msk [vmem:[%s2223_s2 + $0x38] sm:$0xff] %vm1113_vm0, %v1056_v13  ;;  %v1087_v15 = vmul.f32 %v1071_v1, %v1909_v31 }
 0x4c9   :  { %1138 = vst.msk [vmem:[%s2224_s3 + $0x40] sm:$0xff] %vm1113_vm0, %v1089_v49 }
 0x4ca   :  { %1137 = vst.msk [vmem:[%s2224_s3 + $0x38] sm:$0xff] %vm1113_vm0, %v1088_v38 }
 0x4cb   :  { %1120 = vst.msk [vmem:[%s2223_s2 + $0x30] sm:$0xff] %vm1113_vm0, %v1055_v11 }
 0x4cc   :  { %1136 = vst.msk [vmem:[%s2224_s3 + $0x30] sm:$0xff] %vm1113_vm0, %v1087_v15  ;;  %v1040_v51 = vpop.xlane.xlu1 %1039  ;;  %v1038_v7 = vpop.xlane.xlu2 %1037 }
 0x4cd   :  { %v1060_v31 = vmul.f32 %v1040_v51, %v1930_v53  ;;  %v1076_v5 = vsub.f32 1.0, %v1040_v51  ;;  %v1059_v4 = vmul.f32 %v1038_v7, %v1933_v44  ;;  %v1075_v63 = vsub.f32 1.0, %v1038_v7  ;;  %v1036_v17 = vpop.xlane.xlu0 %1035 }
 0x4ce   :  { %v1074_v60 = vsub.f32 1.0, %v1036_v17  ;;  %v1058_v3 = vmul.f32 %v1036_v17, %v1936_v30 }
 0x4cf   :  { %v1092_v41 = vmul.f32 %v1076_v5, %v1930_v53  ;;  %1125 = vst.msk [vmem:[%s2223_s2 + $0x58] sm:$0xff] %vm1113_vm0, %v1060_v31  ;;  %v1091_v34 = vmul.f32 %v1075_v63, %v1933_v44  ;;  %v2458_v53 = vld [vmem:[#allocation5_spill] sm:$0xff]  ;;  %v2459_v44 = vld [vmem:[#allocation44_spill] sm:$0xff] }
 0x4d0   :  { %1124 = vst.msk [vmem:[%s2223_s2 + $0x50] sm:$0xff] %vm1113_vm0, %v1059_v4  ;;  %v1090_v27 = vmul.f32 %v1074_v60, %v1936_v30  ;;  %v816_v61 = vmul.f32 %v2459_v44, %v2458_v53 }
 0x4d1   :  { %1141 = vst.msk [vmem:[%s2224_s3 + $0x58] sm:$0xff] %vm1113_vm0, %v1092_v41 }
 0x4d2   :  { %1140 = vst.msk [vmem:[%s2224_s3 + $0x50] sm:$0xff] %vm1113_vm0, %v1091_v34 }
 0x4d3   :  { %1123 = vst.msk [vmem:[%s2223_s2 + $0x48] sm:$0xff] %vm1113_vm0, %v1058_v3 }
 0x4d4   :  { %1139 = vst.msk [vmem:[%s2224_s3 + $0x48] sm:$0xff] %vm1113_vm0, %v1090_v27  ;;  %v1046_v30 = vpop.xlane.xlu1 %1045  ;;  %v1044_v8 = vpop.xlane.xlu2 %1043 }
 0x4d5   :  { %v1063_v56 = vmul.f32 %v1046_v30, %v2460_v16  ;;  %v1079_v21 = vsub.f32 1.0, %v1046_v30  ;;  %v1062_v23 = vmul.f32 %v1044_v8, %v816_v61  ;;  %v1078_v25 = vsub.f32 1.0, %v1044_v8  ;;  %v1042_v57 = vpop.xlane.xlu0 %1041 }
 0x4d6   :  { %v1077_v46 = vsub.f32 1.0, %v1042_v57  ;;  %v1061_v43 = vmul.f32 %v1042_v57, %v2461_v58 }
 0x4d7   :  { %v1095_v47 = vmul.f32 %v1079_v21, %v2460_v16  ;;  %1128 = vst.msk [vmem:[%s2223_s2 + $0x70] sm:$0xff] %vm1113_vm0, %v1063_v56  ;;  %v1094_v20 = vmul.f32 %v1078_v25, %v816_v61 }
 0x4d8   :  { %1127 = vst.msk [vmem:[%s2223_s2 + $0x68] sm:$0xff] %vm1113_vm0, %v1062_v23  ;;  %v1093_v24 = vmul.f32 %v1077_v46, %v2461_v58 }
 0x4d9   :  { %1144 = vst.msk [vmem:[%s2224_s3 + $0x70] sm:$0xff] %vm1113_vm0, %v1095_v47 }
 0x4da   :  { %1143 = vst.msk [vmem:[%s2224_s3 + $0x68] sm:$0xff] %vm1113_vm0, %v1094_v20 }
 0x4db   :  { %1126 = vst.msk [vmem:[%s2223_s2 + $0x60] sm:$0xff] %vm1113_vm0, %v1061_v43 }
 0x4dc   :  { %1142 = vst.msk [vmem:[%s2224_s3 + $0x60] sm:$0xff] %vm1113_vm0, %v1093_v24 }
 0x4dd   :  { %v1048_v6 = vpop.xlane.xlu0 %1047 }
 0x4de   :  { %v1064_v32 = vmul.f32 %v1048_v6, %v818_v55  ;;  %v1080_v52 = vsub.f32 1.0, %v1048_v6 }
 0x4e0   :  { %v1096_v59 = vmul.f32 %v1080_v52, %v818_v55  ;;  %1129 = vst.msk [vmem:[%s2223_s2 + $0x78] sm:$0xff] %vm1113_vm0, %v1064_v32 }
 0x4e2   :  { %1145 = vst.msk [vmem:[%s2224_s3 + $0x78] sm:$0xff] %vm1113_vm0, %v1096_v59 }

</bundles_post_ra>
